<compile_context>
chip_gen: v6e
topology: v6e:2x2x1
jax: 0.10.0
libtpu: 0.0.40
codegen_flags: <defaults>
</compile_context>

<pallas_src>
import jax
import jax.numpy as jnp
from jax.experimental import pallas as pl
from jax.experimental.pallas import tpu as pltpu


def _fused_kernel(v1_ref, wlt_ref, w2bd_ref, w1bd_ref,
                  arow_ref, blin_ref, crow_ref, out_ref):
    """One row tile (TR = nb * C rows == nb whole batch elements) per step.

    v1_ref  : (TR, L)  bf16  flattened, permuted activations
    wlt_ref : (L, M)   bf16  linear weight, pre-transposed + pre-cast
    w2bd_ref: (TR, TR) bf16  kron(I_nb, W_conv2)  (block-diagonal 1x1 conv)
    w1bd_ref: (TR, TR) bf16  kron(I_nb, W_conv1)
    arow_ref: (TR, 1)  f32   rowsum(W_conv2) tiled per row (rank-1 bias factor)
    blin_ref: (1, M)   f32   linear bias
    crow_ref: (TR, 1)  f32   b_conv1 + b_conv2 tiled per row
    out_ref : (TR, M)  f32
    """
    v1 = v1_ref[...]                                              # (TR, L) bf16

    # Big matmul: bf16 operands, f32 accumulation on the MXU.
    v2 = jnp.dot(v1, wlt_ref[...],
                 preferred_element_type=jnp.float32)              # (TR, M) f32

    # Both 1x1 convs as block-diagonal bf16 matmuls (K = TR instead of K = 10);
    # v5 + v6 is just the sum of the two MXU results.
    y = jnp.dot(w2bd_ref[...], v2.astype(jnp.bfloat16),
                preferred_element_type=jnp.float32)               # (TR, M)
    y = y + jnp.dot(w1bd_ref[...], v1,
                    preferred_element_type=jnp.float32)           # (TR, M)

    # Folded bias epilogue:  rowsum(W2) ⊗ b_lin  +  (b_conv1 + b_conv2),
    # kept as rank-1 factors so the resident operand is O(TR + M).
    out_ref[...] = (y + arow_ref[...] * blin_ref[...]
                    + crow_ref[...]).astype(out_ref.dtype)


def _pick_nb(B, C, max_rows=256):
    """Batches per row tile: nb | B, nb*C a multiple of 8, nb*C <= max_rows.
    Prefer >= 2 tiles (feeds both v7x TensorCores) and, among those, the
    largest tile with >= 128 rows (good MXU row utilization on v6e/v7x).
    Fallback nb = B (single full-array tile, always a legal block shape)."""
    valid = [nb for nb in range(1, B + 1)
             if B % nb == 0 and (nb * C) % 8 == 0 and nb * C <= max_rows]
    if not valid:
        return B
    multi = [nb for nb in valid if B // nb >= 2]
    pool = multi if multi else valid
    big = [nb for nb in pool if nb * C >= 128]
    return max(big) if big else max(pool)


@jax.jit
def model_forward(x1, w_lin, b_lin, w_conv1, b_conv1, w_conv2, b_conv2):
    """x1: (B, L, C) float32. Returns x2: (B, C, M)."""
    B, L, C = x1.shape
    M = w_lin.shape[0]
    # Coherent-graph requirement (see TODO at top): v5 + v6 needs M == L.
    assert M == L, "add v5 + v6 requires out_features == in_features"
    # TODO(synk): at the real module width M=800, pad M to a multiple of 128
    # (896) in wlt/b_lin/out and slice afterwards to keep lane-dense stores.

    nb = _pick_nb(B, C)
    tr = nb * C
    n_tiles = (B * C) // tr

    # One-time layout / cast work (fused by XLA into the producing ops):
    #  * x1 permute -> row-major (B*C, L), cast ONCE to bf16 (halves activation
    #    HBM traffic and removes the per-step in-kernel VPU cast).
    #  * w_lin transpose rides its bf16 cast (no extra f32 round trip).
    #  * both 1x1 convs become block-diagonal bf16 weights kron(I_nb, W).
    v1_flat = (jnp.transpose(x1, (0, 2, 1))
               .reshape(B * C, L).astype(jnp.bfloat16))           # (B*C, L)
    wlt = jnp.transpose(w_lin, (1, 0)).astype(jnp.bfloat16)       # (L, M)

    w2 = w_conv2.reshape(C, C)
    w1 = w_conv1.reshape(C, C)
    eye = jnp.eye(nb, dtype=jnp.float32)
    w2bd = jnp.kron(eye, w2).astype(jnp.bfloat16)                 # (tr, tr)
    w1bd = jnp.kron(eye, w1).astype(jnp.bfloat16)                 # (tr, tr)

    # Folded bias, factored (rank-1 + per-row constant), kept in f32:
    #   bias[r, m] = rowsum(W2)[r % C] * b_lin[m] + (b1 + b2)[r % C]
    arow = jnp.tile(jnp.sum(w2, axis=1), nb)[:, None]             # (tr, 1)
    crow = jnp.tile(b_conv1 + b_conv2, nb)[:, None]               # (tr, 1)
    blin = b_lin[None, :]                                         # (1, M)

    # Per-step working set (Pallas double-buffers every block by default);
    # keep scoped VMEM comfortably above it so the documented real shapes
    # (L=2800, M=800, tr~256) also clear v5e's 16 MiB default scoped limit.
    block_bytes = (tr * L * 2 + L * M * 2 + 2 * tr * tr * 2
                   + 2 * tr * 4 + M * 4 + tr * M * 4)
    vmem_limit = int(min(max(2 * block_bytes + (4 << 20), 32 << 20), 64 << 20))

    out_flat = pl.pallas_call(
        _fused_kernel,
        out_shape=jax.ShapeDtypeStruct((B * C, M), x1.dtype),
        grid=(n_tiles,),
        in_specs=[
            pl.BlockSpec((tr, L), lambda i: (i, 0)),   # activations: tiled rows
            # Grid-invariant operands (constant index_map => DMA'd once).
            pl.BlockSpec((L, M), lambda i: (0, 0)),
            pl.BlockSpec((tr, tr), lambda i: (0, 0)),
            pl.BlockSpec((tr, tr), lambda i: (0, 0)),
            pl.BlockSpec((tr, 1), lambda i: (0, 0)),
            pl.BlockSpec((1, M), lambda i: (0, 0)),
            pl.BlockSpec((tr, 1), lambda i: (0, 0)),
        ],
        out_specs=pl.BlockSpec((tr, M), lambda i: (i, 0)),
        compiler_params=pltpu.CompilerParams(
            dimension_semantics=("parallel",),
            vmem_limit_bytes=vmem_limit),
    )(v1_flat, wlt, w2bd, w1bd, arow, blin, crow)

    return out_flat.reshape(B, C, M)


def _reference(x1, w_lin, b_lin, w_conv1, b_conv1, w_conv2, b_conv2):
    """Plain-JAX f32 reference of the same (coherent) graph."""
    C = x1.shape[2]
    v1 = jnp.transpose(x1, (0, 2, 1))                             # (B, C, L)
    v2 = jnp.einsum("bcl,ml->bcm", v1, w_lin) + b_lin             # (B, C, M)
    v5 = jnp.einsum("oc,bcm->bom", w_conv2.reshape(C, C), v2) \
        + b_conv2.reshape(1, -1, 1)
    v6 = jnp.einsum("oc,bcl->bol", w_conv1.reshape(C, C), v1) \
        + b_conv1.reshape(1, -1, 1)
    return v5 + v6


if __name__ == "__main__":
    # Small shapes consistent with the module structure:
    #   channels C = 10 (fixed by the Conv1d definitions),
    #   L = in_features = out_features = 256 (scaled down from 2800/800 so the
    #       v5 + v6 add is well defined and lanes stay 128-aligned),
    #   B = 32 so the row-flattened matmul has 320 rows -> two 160-row tiles
    #       (>=128 MXU rows per tile AND >=2 tiles for v7x's two TensorCores).
    B, L, C = 32, 256, 10

    key = jax.random.PRNGKey(0)
    ks = jax.random.split(key, 7)

    x1 = jax.random.normal(ks[0], (B, L, C), dtype=jnp.float32)

    # PyTorch-style uniform(-1/sqrt(fan_in), 1/sqrt(fan_in)) init, deterministic.
    lin_bound = 1.0 / jnp.sqrt(jnp.float32(L))
    w_lin = jax.random.uniform(ks[1], (L, L), jnp.float32, -lin_bound, lin_bound)
    b_lin = jax.random.uniform(ks[2], (L,), jnp.float32, -lin_bound, lin_bound)

    conv_bound = 1.0 / jnp.sqrt(jnp.float32(C))
    w_conv1 = jax.random.uniform(ks[3], (C, C, 1), jnp.float32, -conv_bound, conv_bound)
    b_conv1 = jax.random.uniform(ks[4], (C,), jnp.float32, -conv_bound, conv_bound)
    w_conv2 = jax.random.uniform(ks[5], (C, C, 1), jnp.float32, -conv_bound, conv_bound)
    b_conv2 = jax.random.uniform(ks[6], (C,), jnp.float32, -conv_bound, conv_bound)

    out = model_forward(x1, w_lin, b_lin, w_conv1, b_conv1, w_conv2, b_conv2)
    out = jax.block_until_ready(out)

    ref = _reference(x1, w_lin, b_lin, w_conv1, b_conv1, w_conv2, b_conv2)
    assert out.shape == (B, C, L), out.shape
    # bf16 MXU operands with f32 accumulation -> relaxed tolerance vs f32 ref.
    assert jnp.allclose(out, ref, atol=5e-2, rtol=5e-2), "mismatch vs reference"

    print("KERNEL_OK")
</pallas_src>

<mosaic_0001>
module attributes {stable_mosaic.version = 11 : i64} {
  func.func @_fused_kernel(%arg0: i32, %arg1: memref<160x256xbf16, #tpu.memory_space<vmem>>, %arg2: memref<256x256xbf16, #tpu.memory_space<vmem>>, %arg3: memref<160x160xbf16, #tpu.memory_space<vmem>>, %arg4: memref<160x160xbf16, #tpu.memory_space<vmem>>, %arg5: memref<160x1xf32, #tpu.memory_space<vmem>>, %arg6: memref<1x256xf32, #tpu.memory_space<vmem>>, %arg7: memref<160x1xf32, #tpu.memory_space<vmem>>, %arg8: memref<160x256xf32, #tpu.memory_space<vmem>>) attributes {dimension_semantics = [#tpu.dimension_semantics<parallel>], iteration_bounds = array<i64: 2>, scalar_prefetch = 0 : i64, scratch_operands = 0 : i64, tpu.core_type = #tpu.core_type<tc>, window_params = [{transform_indices = @transform_0, window_bounds = array<i64: 160, 256>}, {pipeline_mode = #tpu.pipeline_mode<synchronous>, transform_indices = @transform_1, window_bounds = array<i64: 256, 256>}, {pipeline_mode = #tpu.pipeline_mode<synchronous>, transform_indices = @transform_2, window_bounds = array<i64: 160, 160>}, {pipeline_mode = #tpu.pipeline_mode<synchronous>, transform_indices = @transform_3, window_bounds = array<i64: 160, 160>}, {pipeline_mode = #tpu.pipeline_mode<synchronous>, transform_indices = @transform_4, window_bounds = array<i64: 160, 1>}, {pipeline_mode = #tpu.pipeline_mode<synchronous>, transform_indices = @transform_5, window_bounds = array<i64: 1, 256>}, {pipeline_mode = #tpu.pipeline_mode<synchronous>, transform_indices = @transform_6, window_bounds = array<i64: 160, 1>}, {transform_indices = @transform_7, window_bounds = array<i64: 160, 256>}]} {
    %c0 = arith.constant 0 : index
    %c0_0 = arith.constant 0 : index
    %0 = vector.load %arg1[%c0, %c0_0] : memref<160x256xbf16, #tpu.memory_space<vmem>>, vector<160x256xbf16>
    %c0_1 = arith.constant 0 : index
    %c0_2 = arith.constant 0 : index
    %1 = vector.load %arg2[%c0_1, %c0_2] : memref<256x256xbf16, #tpu.memory_space<vmem>>, vector<256x256xbf16>
    %cst = arith.constant dense<0.000000e+00> : vector<160x256xf32>
    %2 = tpu.matmul %0, %1, %cst {dimension_numbers = #tpu.dot_dimension_numbers<[1], [0], [0], [1], [0, 0, 1, 1], [], []>} : vector<160x256xbf16>, vector<256x256xbf16>, vector<160x256xf32> -> vector<160x256xf32>
    %c0_3 = arith.constant 0 : index
    %c0_4 = arith.constant 0 : index
    %3 = vector.load %arg3[%c0_3, %c0_4] : memref<160x160xbf16, #tpu.memory_space<vmem>>, vector<160x160xbf16>
    %4 = arith.truncf %2 : vector<160x256xf32> to vector<160x256xbf16>
    %cst_5 = arith.constant dense<0.000000e+00> : vector<160x256xf32>
    %5 = tpu.matmul %3, %4, %cst_5 {dimension_numbers = #tpu.dot_dimension_numbers<[1], [0], [0], [1], [0, 0, 1, 1], [], []>} : vector<160x160xbf16>, vector<160x256xbf16>, vector<160x256xf32> -> vector<160x256xf32>
    %c0_6 = arith.constant 0 : index
    %c0_7 = arith.constant 0 : index
    %6 = vector.load %arg4[%c0_6, %c0_7] : memref<160x160xbf16, #tpu.memory_space<vmem>>, vector<160x160xbf16>
    %cst_8 = arith.constant dense<0.000000e+00> : vector<160x256xf32>
    %7 = tpu.matmul %6, %0, %cst_8 {dimension_numbers = #tpu.dot_dimension_numbers<[1], [0], [0], [1], [0, 0, 1, 1], [], []>} : vector<160x160xbf16>, vector<160x256xbf16>, vector<160x256xf32> -> vector<160x256xf32>
    %8 = arith.addf %5, %7 : vector<160x256xf32>
    %c0_9 = arith.constant 0 : index
    %c0_10 = arith.constant 0 : index
    %9 = vector.load %arg5[%c0_9, %c0_10] : memref<160x1xf32, #tpu.memory_space<vmem>>, vector<160x1xf32>
    %c0_11 = arith.constant 0 : index
    %c0_12 = arith.constant 0 : index
    %10 = vector.load %arg6[%c0_11, %c0_12] : memref<1x256xf32, #tpu.memory_space<vmem>>, vector<1x256xf32>
    %11 = vector.broadcast %9 : vector<160x1xf32> to vector<160x256xf32>
    %12 = vector.broadcast %10 : vector<1x256xf32> to vector<160x256xf32>
    %13 = arith.mulf %11, %12 : vector<160x256xf32>
    %14 = arith.addf %8, %13 : vector<160x256xf32>
    %c0_13 = arith.constant 0 : index
    %c0_14 = arith.constant 0 : index
    %15 = vector.load %arg7[%c0_13, %c0_14] : memref<160x1xf32, #tpu.memory_space<vmem>>, vector<160x1xf32>
    %16 = vector.broadcast %15 : vector<160x1xf32> to vector<160x256xf32>
    %17 = arith.addf %14, %16 : vector<160x256xf32>
    %c0_15 = arith.constant 0 : index
    %c0_16 = arith.constant 0 : index
    %18 = vector.load %arg8[%c0_15, %c0_16] : memref<160x256xf32, #tpu.memory_space<vmem>>, vector<160x256xf32>
    tpu.vector_store %arg8[%c0_15, %c0_16], %17 {strides = array<i32>} : memref<160x256xf32, #tpu.memory_space<vmem>>, vector<160x256xf32>,
    return
  }
  func.func @transform_0(%arg0: i32) -> (i32, i32) {
    %c0_i32 = arith.constant 0 : i32
    %c0_i32_0 = arith.constant 0 : i32
    return %arg0, %c0_i32 : i32, i32
  }
  func.func @transform_1(%arg0: i32) -> (i32, i32) {
    %c0_i32 = arith.constant 0 : i32
    %c0_i32_0 = arith.constant 0 : i32
    %c0_i32_1 = arith.constant 0 : i32
    return %c0_i32, %c0_i32_0 : i32, i32
  }
  func.func @transform_2(%arg0: i32) -> (i32, i32) {
    %c0_i32 = arith.constant 0 : i32
    %c0_i32_0 = arith.constant 0 : i32
    %c0_i32_1 = arith.constant 0 : i32
    return %c0_i32, %c0_i32_0 : i32, i32
  }
  func.func @transform_3(%arg0: i32) -> (i32, i32) {
    %c0_i32 = arith.constant 0 : i32
    %c0_i32_0 = arith.constant 0 : i32
    %c0_i32_1 = arith.constant 0 : i32
    return %c0_i32, %c0_i32_0 : i32, i32
  }
  func.func @transform_4(%arg0: i32) -> (i32, i32) {
    %c0_i32 = arith.constant 0 : i32
    %c0_i32_0 = arith.constant 0 : i32
    %c0_i32_1 = arith.constant 0 : i32
    return %c0_i32, %c0_i32_0 : i32, i32
  }
  func.func @transform_5(%arg0: i32) -> (i32, i32) {
    %c0_i32 = arith.constant 0 : i32
    %c0_i32_0 = arith.constant 0 : i32
    %c0_i32_1 = arith.constant 0 : i32
    return %c0_i32, %c0_i32_0 : i32, i32
  }
  func.func @transform_6(%arg0: i32) -> (i32, i32) {
    %c0_i32 = arith.constant 0 : i32
    %c0_i32_0 = arith.constant 0 : i32
    %c0_i32_1 = arith.constant 0 : i32
    return %c0_i32, %c0_i32_0 : i32, i32
  }
  func.func @transform_7(%arg0: i32) -> (i32, i32) {
    %c0_i32 = arith.constant 0 : i32
    %c0_i32_0 = arith.constant 0 : i32
    return %arg0, %c0_i32 : i32, i32
  }
}

</mosaic_0001>

<bundles_post_ra>
// kernel: tile.13
= control target key start
LH: loop header
LB: loop body
LE: loop exit
PB: predicated region body
PF: predicated region fallthrough
CT: control target
= control target key end

     0   :  { %s28_s0 = inlined_call_operand.vmem [shape: f32[10], index: 0, kind: input, shape index: {}]   ;;  %s29_s1 = inlined_call_operand.vmem [shape: f32[16,10], index: 1, kind: output, shape index: {}]  }
   0x1   :  { %v4_v0 = vld [vmem:[%s28_s0] ss:$0 sm:$0xff] }
   0x2   :  { %5 = vst [vmem:[%s29_s1] sm:$0xff] %v4_v0  ;;  %8 = vst [vmem:[%s29_s1 + $0x8] sm:$0xff] %v4_v0 }

// kernel: tile.0
= control target key start
LH: loop header
LB: loop body
LE: loop exit
PB: predicated region body
PF: predicated region fallthrough
CT: control target
= control target key end

     0   :  { %s240_s10 = smov 126   ;;  %s241_s11 = smov 127   ;;  %vm3_vm0 = vcmask 7168   ;;  %s475_s0 = inlined_call_operand.vmem [shape: f32[16,10], index: 0, kind: input, shape index: {}]   ;;  %s476_s1 = inlined_call_operand.vmem [shape: f32[160,1], index: 1, kind: output, shape index: {}]  }
   0x1   :  { %v29_v0 = vld.sshfl [vmem:[%s475_s0] sm:$0xff pattern:$0xe147ad03]   ;;  %v188_v2 = vld.sshfl [vmem:[%s475_s0 + $0x2] sm:$0xff pattern:$0x47ad0369]  }
   0x2   :  { %v10_v1 = vld.sshfl [vmem:[%s475_s0] sm:$0xff pattern:$0xbe147ad0]   ;;  %30 = vrot.lane.b32.xlu1 %v29_v0, %s240_s10  ;;  %v182_v3 = vld.sshfl [vmem:[%s475_s0 + $0x2] sm:$0xff pattern:$0x147ad036]  }
   0x3   :  { %11 = vrot.lane.b32.xlu0 %v10_v1, %s241_s11  ;;  %s242_s16 = smov 125   ;;  %v199_v4 = vld.sshfl [vmem:[%s475_s0 + $0x2] sm:$0xff pattern:$0x7ad0369c]   ;;  %s243_s21 = smov 124  }
   0x4   :  { %v67_v5 = vld.sshfl [vmem:[%s475_s0] sm:$0xff pattern:$0x147ad036]   ;;  %s244_s22 = smov 123   ;;  %s245_s6 = smov 122  }
   0x5   :  { %v209_v6 = vld.sshfl [vmem:[%s475_s0 + $0x1] sm:$0xff pattern:$0xbe147ad0]   ;;  %v101_v7 = vld.sshfl [vmem:[%s475_s0] sm:$0xff pattern:$0x47ad0369]  }
   0x6   :  { %41 = vrot.lane.b32.xlu1 %v188_v2, %s240_s10  ;;  %v2_v8 = vld [vmem:[%s475_s0] sm:$0xff]   ;;  %v177_v9 = vld [vmem:[%s475_s0 + $0x8] sm:$0xff]   ;;  %s246_s7 = smov 121   ;;  %s248_s12 = smov 119  }
   0x7   :  { %22 = vrot.lane.b32.xlu0 %v182_v3, %s241_s11  ;;  %4 = vst.msk [vmem:[%s476_s1] ss:$10 sm:$0xff] %vm3_vm0, %v2_v8   ;;  %178 = vst.msk [vmem:[%s476_s1 + $0x50] ss:$10 sm:$0xff] %vm3_vm0, %v177_v9  }
   0x8   :  { %v221_v10 = vld.sshfl [vmem:[%s475_s0 + $0x1] sm:$0xff pattern:$0xe147ad03]   ;;  %v139_v11 = vld.sshfl [vmem:[%s475_s0] sm:$0xff pattern:$0x7ad0369c]  }
   0x9   :  { %s247_s0 = smov 120  }
   0xa   :  { %60 = vrot.lane.b32.xlu1 %v188_v2, %s242_s16 }
   0xb   :  { %49 = vrot.lane.b32.xlu0 %v29_v0, %s242_s16 }
   0xe   :  { %77 = vrot.lane.b32.xlu1 %v199_v4, %s243_s21 }
   0xf   :  { %68 = vrot.lane.b32.xlu0 %v67_v5, %s243_s21 }
  0x12   :  { %94 = vrot.lane.b32.xlu1 %v199_v4, %s244_s22 }
  0x13   :  { %85 = vrot.lane.b32.xlu0 %v67_v5, %s244_s22 }
  0x16   :  { %111 = vrot.lane.b32.xlu1 %v209_v6, %s245_s6 }
  0x17   :  { %102 = vrot.lane.b32.xlu0 %v101_v7, %s245_s6 }
  0x1a   :  { %130 = vrot.lane.b32.xlu1 %v209_v6, %s246_s7 }
  0x1b   :  { %121 = vrot.lane.b32.xlu0 %v101_v7, %s246_s7 }
  0x1e   :  { %149 = vrot.lane.b32.xlu1 %v221_v10, %s247_s0 }
  0x1f   :  { %140 = vrot.lane.b32.xlu0 %v139_v11, %s247_s0 }
  0x22   :  { %168 = vrot.lane.b32.xlu1 %v221_v10, %s248_s12 }
  0x23   :  { %159 = vrot.lane.b32.xlu0 %v139_v11, %s248_s12 }
  0x74   :  { %v31_v12 = vpop.permute.xlu1 %30  }
  0x75   :  { %v12_v13 = vpop.permute.xlu0 %11   ;;  %185 = vst.msk [vmem:[%s476_s1 + $0x20] ss:$-30 sm:$0x3] %vm3_vm0, %v31_v12   ;;  %186 = vst.msk [vmem:[%s476_s1 + $0xc0] ss:$-30 sm:$0x7c] %vm3_vm0, %v31_v12  }
  0x76   :  { %187 = vst.msk [vmem:[%s476_s1 + $0x87] sm:$0x80] %vm3_vm0, %v31_v12   ;;  %179 = vst.msk [vmem:[%s476_s1 + $0x1] ss:$130 sm:$0x3] %vm3_vm0, %v12_v13  }
  0x77   :  { %180 = vst.msk [vmem:[%s476_s1 + $0xa1] ss:$-30 sm:$0x3c] %vm3_vm0, %v12_v13   ;;  %181 = vst.msk [vmem:[%s476_s1 + $0x141] ss:$-30 sm:$0xc0] %vm3_vm0, %v12_v13  }
  0x78   :  { %v42_v14 = vpop.permute.xlu1 %41  }
  0x79   :  { %v23_v15 = vpop.permute.xlu0 %22   ;;  %189 = vst.msk [vmem:[%s476_s1 + $0x70] ss:$-30 sm:$0xf] %vm3_vm0, %v42_v14   ;;  %190 = vst.msk [vmem:[%s476_s1 + $0x110] ss:$-30 sm:$0xf0] %vm3_vm0, %v42_v14  }
  0x7a   :  { %183 = vst.msk [vmem:[%s476_s1 + $0x51] ss:$-30 sm:$0x7] %vm3_vm0, %v23_v15   ;;  %184 = vst.msk [vmem:[%s476_s1 + $0xf1] ss:$-30 sm:$0xf8] %vm3_vm0, %v23_v15  }
  0x7c   :  { %v61_v16 = vpop.permute.xlu1 %60  }
  0x7d   :  { %v50_v17 = vpop.permute.xlu0 %49   ;;  %195 = vst.msk [vmem:[%s476_s1 + $0x71] ss:$-30 sm:$0xf] %vm3_vm0, %v61_v16   ;;  %196 = vst.msk [vmem:[%s476_s1 + $0x111] ss:$-30 sm:$0xf0] %vm3_vm0, %v61_v16  }
  0x7e   :  { %191 = vst.msk [vmem:[%s476_s1 + $0x21] ss:$-30 sm:$0x3] %vm3_vm0, %v50_v17   ;;  %192 = vst.msk [vmem:[%s476_s1 + $0xc1] ss:$-30 sm:$0x7c] %vm3_vm0, %v50_v17  }
  0x7f   :  { %193 = vst.msk [vmem:[%s476_s1 + $0x88] sm:$0x80] %vm3_vm0, %v50_v17  }
  0x80   :  { %v78_v18 = vpop.permute.xlu1 %77  }
  0x81   :  { %v69_v19 = vpop.permute.xlu0 %68   ;;  %200 = vst.msk [vmem:[%s476_s1 + $0x90] ss:$-30 sm:$0x1f] %vm3_vm0, %v78_v18   ;;  %201 = vst.msk [vmem:[%s476_s1 + $0x130] ss:$-30 sm:$0xe0] %vm3_vm0, %v78_v18  }
  0x82   :  { %197 = vst.msk [vmem:[%s476_s1 + $0x40] ss:$-30 sm:$0x7] %vm3_vm0, %v69_v19   ;;  %198 = vst.msk [vmem:[%s476_s1 + $0xe0] ss:$-30 sm:$0xf8] %vm3_vm0, %v69_v19  }
  0x84   :  { %v95_v20 = vpop.permute.xlu1 %94  }
  0x85   :  { %v86_v21 = vpop.permute.xlu0 %85   ;;  %205 = vst.msk [vmem:[%s476_s1 + $0x91] ss:$-30 sm:$0x1f] %vm3_vm0, %v95_v20   ;;  %206 = vst.msk [vmem:[%s476_s1 + $0x131] ss:$-30 sm:$0xe0] %vm3_vm0, %v95_v20  }
  0x86   :  { %202 = vst.msk [vmem:[%s476_s1 + $0x41] ss:$-30 sm:$0x7] %vm3_vm0, %v86_v21   ;;  %203 = vst.msk [vmem:[%s476_s1 + $0xe1] ss:$-30 sm:$0xf8] %vm3_vm0, %v86_v21  }
  0x88   :  { %v112_v22 = vpop.permute.xlu1 %111  }
  0x89   :  { %v103_v23 = vpop.permute.xlu0 %102   ;;  %210 = vst.msk [vmem:[%s476_s1 + $0x10] ss:$130 sm:$0x3] %vm3_vm0, %v112_v22   ;;  %211 = vst.msk [vmem:[%s476_s1 + $0xb0] ss:$-30 sm:$0x3c] %vm3_vm0, %v112_v22  }
  0x8a   :  { %212 = vst.msk [vmem:[%s476_s1 + $0x150] ss:$-30 sm:$0xc0] %vm3_vm0, %v112_v22   ;;  %207 = vst.msk [vmem:[%s476_s1 + $0x60] ss:$-30 sm:$0xf] %vm3_vm0, %v103_v23  }
  0x8b   :  { %208 = vst.msk [vmem:[%s476_s1 + $0x100] ss:$-30 sm:$0xf0] %vm3_vm0, %v103_v23  }
  0x8c   :  { %v131_v24 = vpop.permute.xlu1 %130  }
  0x8d   :  { %v122_v25 = vpop.permute.xlu0 %121   ;;  %216 = vst.msk [vmem:[%s476_s1 + $0x11] ss:$130 sm:$0x3] %vm3_vm0, %v131_v24   ;;  %217 = vst.msk [vmem:[%s476_s1 + $0xb1] ss:$-30 sm:$0x3c] %vm3_vm0, %v131_v24  }
  0x8e   :  { %218 = vst.msk [vmem:[%s476_s1 + $0x151] ss:$-30 sm:$0xc0] %vm3_vm0, %v131_v24   ;;  %213 = vst.msk [vmem:[%s476_s1 + $0x61] ss:$-30 sm:$0xf] %vm3_vm0, %v122_v25  }
  0x8f   :  { %214 = vst.msk [vmem:[%s476_s1 + $0x101] ss:$-30 sm:$0xf0] %vm3_vm0, %v122_v25  }
  0x90   :  { %v150_v26 = vpop.permute.xlu1 %149  }
  0x91   :  { %v141_v27 = vpop.permute.xlu0 %140   ;;  %222 = vst.msk [vmem:[%s476_s1 + $0x30] ss:$-30 sm:$0x3] %vm3_vm0, %v150_v26   ;;  %223 = vst.msk [vmem:[%s476_s1 + $0xd0] ss:$-30 sm:$0x7c] %vm3_vm0, %v150_v26  }
  0x92   :  { %224 = vst.msk [vmem:[%s476_s1 + $0x97] sm:$0x80] %vm3_vm0, %v150_v26   ;;  %219 = vst.msk [vmem:[%s476_s1 + $0x80] ss:$-30 sm:$0x1f] %vm3_vm0, %v141_v27  }
  0x93   :  { %220 = vst.msk [vmem:[%s476_s1 + $0x120] ss:$-30 sm:$0xe0] %vm3_vm0, %v141_v27  }
  0x94   :  { %v169_v28 = vpop.permute.xlu1 %168  }
  0x95   :  { %v160_v29 = vpop.permute.xlu0 %159   ;;  %228 = vst.msk [vmem:[%s476_s1 + $0x31] ss:$-30 sm:$0x3] %vm3_vm0, %v169_v28   ;;  %229 = vst.msk [vmem:[%s476_s1 + $0xd1] ss:$-30 sm:$0x7c] %vm3_vm0, %v169_v28  }
  0x96   :  { %230 = vst.msk [vmem:[%s476_s1 + $0x98] sm:$0x80] %vm3_vm0, %v169_v28   ;;  %225 = vst.msk [vmem:[%s476_s1 + $0x81] ss:$-30 sm:$0x1f] %vm3_vm0, %v160_v29  }
  0x97   :  { %226 = vst.msk [vmem:[%s476_s1 + $0x121] ss:$-30 sm:$0xe0] %vm3_vm0, %v160_v29  }

// kernel: model_forward.1
= control target key start
LH: loop header
LB: loop body
LE: loop exit
PB: predicated region body
PF: predicated region fallthrough
CT: control target
= control target key end

     0   :  { %s2113_s24 = smov 0   ;;  %s2878_s0 = inlined_call_operand.vmem [shape: bf16[320,256], index: 0, kind: input, shape index: {}]   ;;  %s2879_s1 = inlined_call_operand.vmem [shape: bf16[256,256], index: 1, kind: input, shape index: {}]   ;;  %s2880_s2 = inlined_call_operand.vmem [shape: bf16[160,160], index: 2, kind: input, shape index: {}]   ;;  %s2881_s3 = inlined_call_operand.vmem [shape: bf16[160,160], index: 3, kind: input, shape index: {}]   ;;  %s2882_s4 = inlined_call_operand.vmem [shape: f32[160,1], index: 4, kind: input, shape index: {}]   ;;  %s2883_s5 = inlined_call_operand.vmem [shape: f32[1,256], index: 5, kind: input, shape index: {}]   ;;  %s2884_s6 = inlined_call_operand.vmem [shape: f32[160,1], index: 6, kind: input, shape index: {}]   ;;  %s2885_s7 = inlined_call_operand.vmem [shape: f32[320,256], index: 7, kind: output, shape index: {}]  }
   0x1 LB: > { %s1770_s25 = sadd.s32 4294967295, %s2070_s24   ;;  %p1774_p0 = scmp.ge.s32.totalorder %s2070_s24, 1  ;;  %s2070_s24 = sphi %s2113_s24, %s17_s24  }
   0x2   : > { %p239_p1 = scmp.lt.s32.totalorder %s2070_s24, 3 }
   0x4   : > { %p240_p2 = pnand %p1774_p0, %p239_p1 }
   0x6   : > { %243 = sbr.rel (%p240_p2) target bundleno = 651 (0x28b), region = 48 }
   0xb   : > { %v1926_v0 = vld [vmem:[%s2879_s1 + $0x74] ss:$8 sps:$4 sm:$0xff]   ;;  %v1928_v1 = vld [vmem:[%s2879_s1 + $0x70] ss:$8 sps:$4 sm:$0xff]   ;;  %v1929_v2 = vld [vmem:[%s2879_s1 + $0x64] ss:$8 sps:$4 sm:$0xff]  }
   0xc   : > { %600 = vmatprep.subr.bf16.mxu0 %v1926_v0  ;;  %v1931_v3 = vld [vmem:[%s2879_s1 + $0x60] ss:$8 sps:$4 sm:$0xff]   ;;  %v1932_v4 = vld [vmem:[%s2879_s1 + $0x54] ss:$8 sps:$4 sm:$0xff]   ;;  %s273_s13 = smul.u32 20, %s1770_s25  ;;  %vm883_vm0 = vcmask 261120  }
   0xd   : > { %601 = vmatpush1.bf16.msra.mxu0 %v1928_v1  ;;  %v1934_v5 = vld [vmem:[%s2879_s1 + $0x50] ss:$8 sps:$4 sm:$0xff]   ;;  %v1935_v6 = vld [vmem:[%s2879_s1 + $0x44] ss:$8 sps:$4 sm:$0xff]   ;;  %v1937_v7 = vld [vmem:[%s2879_s1 + $0x40] ss:$8 sps:$4 sm:$0xff]  }
   0xe   : > { %602 = vmatprep.subr.bf16.mxu0 %v1929_v2  ;;  %p274_p3 = scmp.lt.s32.totalorder %s273_s13, 39  ;;  %v1938_v8 = vld [vmem:[%s2879_s1 + $0x34] ss:$8 sps:$4 sm:$0xff]   ;;  %v1940_v9 = vld [vmem:[%s2879_s1 + $0x30] ss:$8 sps:$4 sm:$0xff]  }
   0xf   : > { %v1941_v10 = vld [vmem:[%s2879_s1 + $0x24] ss:$8 sps:$4 sm:$0xff]   ;;  %v1943_v11 = vld [vmem:[%s2879_s1 + $0x20] ss:$8 sps:$4 sm:$0xff]   ;;  %v1944_v12 = vld [vmem:[%s2879_s1 + $0x14] ss:$8 sps:$4 sm:$0xff]  }
  0x10   : > { %s2917_s13 = smov (!%p274_p3, %s273_s13), 39  ;;  %v1946_v14 = vld [vmem:[%s2879_s1 + $0x10] ss:$8 sps:$4 sm:$0xff]   ;;  %v1947_v15 = vld [vmem:[%s2879_s1 + $0x4] ss:$8 sps:$4 sm:$0xff]  }
  0x11   : > { %603 = vmatpush1.bf16.msra.mxu0 %v1931_v3  ;;  %s1893_s27 = sshll.u32 %s2917_s13, 3  ;;  %v1949_v16 = vld [vmem:[%s2879_s1] ss:$8 sps:$4 sm:$0xff]   ;;  %v1950_v17 = vld [vmem:[%s2879_s1 + $0xf4] ss:$8 sps:$4 sm:$0xff]   ;;  %s1894_s26 = sshll.u32 %s2917_s13, 4 }
  0x12   : > { %604 = vmatprep.subr.bf16.mxu0 %v1932_v4  ;;  %s2163_s9 = scalar_lea.vmem %s2878_s0, %s1893_s27  ;;  %v1952_v18 = vld [vmem:[%s2879_s1 + $0xf0] ss:$8 sps:$4 sm:$0xff]   ;;  %v1953_v19 = vld [vmem:[%s2879_s1 + $0xe4] ss:$8 sps:$4 sm:$0xff]   ;;  %v1955_v22 = vld [vmem:[%s2879_s1 + $0xe0] ss:$8 sps:$4 sm:$0xff]   ;;  %s2739_s29 = scalar_lea.vmem %s2885_s7, %s1894_s26 }
  0x13   : > { %v2169_v13 = vld [vmem:[%s2163_s9 + $0x4] ss:$8 sps:$4 sm:$0xff]   ;;  %v2191_v20 = vld [vmem:[%s2163_s9 + $0x74] ss:$8 sps:$4 sm:$0xff]   ;;  %v2194_v21 = vld [vmem:[%s2163_s9 + $0x70] ss:$8 sps:$4 sm:$0xff]  }
  0x14   : > { %632 = vmatprep.mubr.bf16.mxu0 %v2169_v13  ;;  %v2200_v23 = vld [vmem:[%s2163_s9 + $0x64] ss:$8 sps:$4 sm:$0xff]   ;;  %1895 = vmatprep.subr.bf16.mxu1 %v2191_v20  ;;  %v1956_v24 = vld [vmem:[%s2879_s1 + $0xd4] ss:$8 sps:$4 sm:$0xff]   ;;  %v2207_v25 = vld [vmem:[%s2163_s9 + $0x60] ss:$8 sps:$4 sm:$0xff]  }
  0x15   : > { %605 = vmatpush1.bf16.msra.mxu0 %v1934_v5  ;;  %1905 = vmatpush1.bf16.msra.mxu1 %v2194_v21  ;;  %v2211_v26 = vld [vmem:[%s2163_s9 + $0x54] ss:$8 sps:$4 sm:$0xff]   ;;  %v1958_v27 = vld [vmem:[%s2879_s1 + $0xd0] ss:$8 sps:$4 sm:$0xff]   ;;  %v1959_v28 = vld [vmem:[%s2879_s1 + $0xc4] ss:$8 sps:$4 sm:$0xff]  }
  0x16   : > { %606 = vmatprep.subr.bf16.mxu0 %v1935_v6  ;;  %1896 = vmatprep.subr.bf16.mxu1 %v2200_v23  ;;  %v2221_v29 = vld [vmem:[%s2163_s9 + $0x50] ss:$8 sps:$4 sm:$0xff]   ;;  %v2225_v30 = vld [vmem:[%s2163_s9 + $0x44] ss:$8 sps:$4 sm:$0xff]   ;;  %v1961_v31 = vld [vmem:[%s2879_s1 + $0xc0] ss:$8 sps:$4 sm:$0xff]  }
  0x17   : > { %v1962_v32 = vld [vmem:[%s2879_s1 + $0xb4] ss:$8 sps:$4 sm:$0xff]   ;;  %v2235_v33 = vld [vmem:[%s2163_s9 + $0x40] ss:$8 sps:$4 sm:$0xff]   ;;  %v1964_v35 = vld [vmem:[%s2879_s1 + $0xb0] ss:$8 sps:$4 sm:$0xff]  }
  0x18   : > { %v1983_v34 = vld [vmem:[%s2163_s9 + $0x34] ss:$8 sps:$4 sm:$0xff]   ;;  %v1965_v36 = vld [vmem:[%s2879_s1 + $0xa4] ss:$8 sps:$4 sm:$0xff]   ;;  %v1985_v37 = vld [vmem:[%s2163_s9 + $0x30] ss:$8 sps:$4 sm:$0xff]  }
  0x19   : > { %607 = vmatpush1.bf16.msra.mxu0 %v1937_v7  ;;  %1906 = vmatpush1.bf16.msra.mxu1 %v2207_v25  ;;  %v1980_v38 = vld [vmem:[%s2163_s9 + $0x24] ss:$8 sps:$4 sm:$0xff]   ;;  %v1967_v39 = vld [vmem:[%s2879_s1 + $0xa0] ss:$8 sps:$4 sm:$0xff]   ;;  %v1968_v40 = vld [vmem:[%s2879_s1 + $0x94] ss:$8 sps:$4 sm:$0xff]  }
  0x1a   : > { %608 = vmatprep.subr.bf16.mxu0 %v1938_v8  ;;  %1897 = vmatprep.subr.bf16.mxu1 %v2211_v26  ;;  %v1982_v41 = vld [vmem:[%s2163_s9 + $0x20] ss:$8 sps:$4 sm:$0xff]   ;;  %v1977_v42 = vld [vmem:[%s2163_s9 + $0x14] ss:$8 sps:$4 sm:$0xff]   ;;  %v1970_v43 = vld [vmem:[%s2879_s1 + $0x90] ss:$8 sps:$4 sm:$0xff]  }
  0x1b   : > { %v1971_v44 = vld [vmem:[%s2879_s1 + $0x84] ss:$8 sps:$4 sm:$0xff]   ;;  %v1979_v45 = vld [vmem:[%s2163_s9 + $0x10] ss:$8 sps:$4 sm:$0xff]   ;;  %v1973_v46 = vld [vmem:[%s2879_s1 + $0x80] ss:$8 sps:$4 sm:$0xff]  }
  0x1c   : > { %v1976_v47 = vld [vmem:[%s2163_s9] ss:$8 sps:$4 sm:$0xff]   ;;  %v2001_v48 = vld [vmem:[%s2163_s9 + $0x94] ss:$8 sps:$4 sm:$0xff]   ;;  %v2003_v49 = vld [vmem:[%s2163_s9 + $0x90] ss:$8 sps:$4 sm:$0xff]  }
  0x1d   : > { %609 = vmatpush1.bf16.msra.mxu0 %v1940_v9  ;;  %1907 = vmatpush1.bf16.msra.mxu1 %v2221_v29  ;;  %v1998_v50 = vld [vmem:[%s2163_s9 + $0x84] ss:$8 sps:$4 sm:$0xff]   ;;  %v2000_v51 = vld [vmem:[%s2163_s9 + $0x80] ss:$8 sps:$4 sm:$0xff]   ;;  %v2006_v52 = vld [vmem:[%s2881_s3 + $0x34] ss:$8 sps:$4 sm:$0xff]  }
  0x1e   : > { %610 = vmatprep.subr.bf16.mxu0 %v1941_v10  ;;  %1898 = vmatprep.subr.bf16.mxu1 %v2225_v30  ;;  %v2004_v53 = vld [vmem:[%s2881_s3 + $0x30] ss:$8 sps:$4 sm:$0xff]   ;;  %v2007_v54 = vld [vmem:[%s2881_s3 + $0x44] ss:$8 sps:$4 sm:$0xff]   ;;  %v2009_v55 = vld [vmem:[%s2881_s3 + $0x40] ss:$8 sps:$4 sm:$0xff]  }
  0x1f   : > { %1854 = vmatprep.mubr.msk.bf16.mxu1 %vm883_vm0, %v2006_v52  ;;  %v2010_v56 = vld [vmem:[%s2881_s3 + $0x54] ss:$8 sps:$4 sm:$0xff]   ;;  %v2012_v57 = vld [vmem:[%s2881_s3 + $0x50] ss:$8 sps:$4 sm:$0xff]   ;;  %v2013_v58 = vld [vmem:[%s2881_s3 + $0x64] ss:$8 sps:$4 sm:$0xff]  }
  0x20   : > { %v2015_v59 = vld [vmem:[%s2881_s3 + $0x60] ss:$8 sps:$4 sm:$0xff]   ;;  %v2016_v60 = vld [vmem:[%s2881_s3 + $0x74] ss:$8 sps:$4 sm:$0xff]   ;;  %v2018_v61 = vld [vmem:[%s2881_s3 + $0x70] ss:$8 sps:$4 sm:$0xff]  }
  0x21   : > { %611 = vmatpush1.bf16.msra.mxu0 %v1943_v11  ;;  %1908 = vmatpush1.bf16.msra.mxu1 %v2235_v33  ;;  %v2019_v62 = vld [vmem:[%s2881_s3 + $0x84] ss:$8 sps:$4 sm:$0xff]   ;;  %v2021_v63 = vld [vmem:[%s2881_s3 + $0x80] ss:$8 sps:$4 sm:$0xff]   ;;  %v2022_v0 = vld [vmem:[%s2881_s3 + $0x94] ss:$8 sps:$4 sm:$0xff]  }
  0x22   : > { %612 = vmatprep.subr.bf16.mxu0 %v1944_v12  ;;  %1899 = vmatprep.subr.bf16.mxu1 %v1983_v34  ;;  %v2024_v1 = vld [vmem:[%s2881_s3 + $0x90] ss:$8 sps:$4 sm:$0xff]   ;;  %v2025_v2 = vld [vmem:[%s2881_s3] ss:$8 sps:$4 sm:$0xff]   ;;  %v2027_v3 = vld [vmem:[%s2881_s3 + $0x4] ss:$8 sps:$4 sm:$0xff]  }
  0x23   : > { %v2030_v4 = vld [vmem:[%s2880_s2 + $0x4] ss:$8 sps:$4 sm:$0xff]   ;;  %v1302_v5 = vld [vmem:[%s2882_s4 + $0x10] sm:$0xff]  ;;  %v2072_v6 = vmov 0   ;;  %v1303_v9 = vld [vmem:[%s2882_s4 + $0x18] sm:$0xff] }
  0x24   : > { %1925 = vset.pattern.permute.xlu1 %v2072_v6  ;;  %v1300_v7 = vld [vmem:[%s2882_s4] sm:$0xff]  ;;  %v2031_v8 = vld [vmem:[%s2881_s3 + $0x14] ss:$8 sps:$4 sm:$0xff]   ;;  %1924 = vset.pattern.permute.xlu0 %v2072_v6  ;;  %v1301_v10 = vld [vmem:[%s2882_s4 + $0x8] sm:$0xff] }
  0x25   : > { %613 = vmatpush1.bf16.msra.mxu0 %v1946_v14  ;;  %1909 = vmatpush1.bf16.msra.mxu1 %v1985_v37  ;;  %v2035_v11 = vld [vmem:[%s2881_s3 + $0x10] ss:$8 sps:$4 sm:$0xff]   ;;  %v1305_v12 = vld [vmem:[%s2882_s4 + $0x28] sm:$0xff]  ;;  %v1516_v52 = vld [vmem:[%s2884_s6 + $0x20] sm:$0xff] }
  0x26   : > { %614 = vmatprep.subr.bf16.mxu0 %v1947_v15  ;;  %1900 = vmatprep.subr.bf16.mxu1 %v1980_v38  ;;  %v2037_v14 = vld [vmem:[%s2881_s3 + $0x24] ss:$8 sps:$4 sm:$0xff]   ;;  %v1307_v15 = vld [vmem:[%s2882_s4 + $0x38] sm:$0xff] }
  0x27   : > { %1333 = vperm.xlu1 %1925, %v1302_v5   ;;  %1323 = vperm.xlu0 %1924, %v1300_v7   ;;  %v1527_v6 = vld [vmem:[%s2884_s6 + $0x78] sm:$0xff] }
  0x29   : > { %615 = vmatpush1.bf16.msra.mxu0 %v1949_v16  ;;  %1910 = vmatpush1.bf16.msra.mxu1 %v1982_v41  ;;  %v1306_v16 = vld [vmem:[%s2882_s4 + $0x30] sm:$0xff] }
  0x2a   : > { %616 = vmatprep.subr.bf16.mxu0 %v1950_v17  ;;  %1901 = vmatprep.subr.bf16.mxu1 %v1977_v42  ;;  %v2041_v17 = vld [vmem:[%s2881_s3 + $0x20] ss:$8 sps:$4 sm:$0xff]  }
  0x2b   : > { %1338 = vperm.xlu1 %1925, %v1303_v9   ;;  %1328 = vperm.xlu0 %1924, %v1301_v10   ;;  %v1529_v10 = vld [vmem:[%s2884_s6 + $0x88] sm:$0xff] }
  0x2d   : > { %617 = vmatpush2.bf16.msra.mxu0 %v1952_v18  ;;  %1911 = vmatpush1.bf16.msra.mxu1 %v1979_v45  ;;  %v1309_v18 = vld [vmem:[%s2882_s4 + $0x48] sm:$0xff] }
  0x2e   : > { %618 = vmatprep.subr.bf16.mxu0 %v1953_v19  ;;  %1902 = vmatprep.subr.bf16.mxu1 %v2169_v13  ;;  %v1308_v19 = vld [vmem:[%s2882_s4 + $0x40] sm:$0xff] }
  0x2f   : > { %1348 = vperm.xlu1 %1925, %v1305_v12   ;;  %v1528_v12 = vld [vmem:[%s2884_s6 + $0x80] sm:$0xff] }
  0x31   : > { %619 = vmatpush2.bf16.msra.mxu0 %v1955_v22  ;;  %1912 = vmatpush1.bf16.msra.mxu1 %v1976_v47  ;;  %v1313_v22 = vld [vmem:[%s2882_s4 + $0x68] sm:$0xff] }
  0x32   : > { %620 = vmatprep.subr.bf16.mxu0 %v1956_v24  ;;  %1903 = vmatprep.subr.bf16.mxu1 %v2001_v48  ;;  %v1312_v24 = vld [vmem:[%s2882_s4 + $0x60] sm:$0xff] }
  0x33   : > { %1358 = vperm.xlu1 %1925, %v1307_v15  }
  0x35   : > { %621 = vmatpush2.bf16.msra.mxu0 %v1958_v27  ;;  %1913 = vmatpush2.bf16.msra.mxu1 %v2003_v49 }
  0x36   : > { %622 = vmatprep.subr.bf16.mxu0 %v1959_v28  ;;  %1904 = vmatprep.subr.bf16.mxu1 %v1998_v50  ;;  %v1314_v28 = vld [vmem:[%s2882_s4 + $0x70] sm:$0xff] }
  0x37   : > { %1368 = vperm.xlu1 %1925, %v1309_v18  }
  0x39   : > { %623 = vmatpush2.bf16.msra.mxu0 %v1961_v31  ;;  %1914 = vmatpush2.bf16.msra.mxu1 %v2000_v51 }
  0x3a   : > { %624 = vmatprep.subr.bf16.mxu0 %v1962_v32  ;;  %v1317_v32 = vld [vmem:[%s2882_s4 + $0x88] sm:$0xff] }
  0x3c   : > { %977 = vmatmul.mubr.bf16.vlgmr.msra.gmra.mxu1 %v2004_v53 }
  0x3d   : > { %625 = vmatpush2.bf16.msra.mxu0 %v1964_v35  ;;  %1855 = vmatprep.mubr.msk.bf16.mxu1 %vm883_vm0, %v2007_v54  ;;  %v1519_v54 = vld [vmem:[%s2884_s6 + $0x38] sm:$0xff] }
  0x3e   : > { %626 = vmatprep.subr.bf16.mxu0 %v1965_v36  ;;  %v1319_v36 = vld [vmem:[%s2882_s4 + $0x98] sm:$0xff] }
  0x41   : > { %627 = vmatpush2.bf16.msra.mxu0 %v1967_v39 }
  0x42   : > { %628 = vmatprep.subr.bf16.mxu0 %v1968_v40 }
  0x44   : > { %987 = vmatmul.mubr.bf16.gmra.mxu1 %v2009_v55 }
  0x45   : > { %629 = vmatpush2.bf16.msra.mxu0 %v1970_v43  ;;  %1856 = vmatprep.mubr.msk.bf16.mxu1 %vm883_vm0, %v2010_v56  ;;  %v1518_v56 = vld [vmem:[%s2884_s6 + $0x30] sm:$0xff] }
  0x46   : > { %630 = vmatprep.subr.bf16.mxu0 %v1971_v44  ;;  %v1512_v44 = vld [vmem:[%s2884_s6] sm:$0xff] }
  0x49   : > { %631 = vmatpush2.bf16.msra.mxu0 %v1973_v46  ;;  %v1515_v46 = vld [vmem:[%s2884_s6 + $0x18] sm:$0xff] }
  0x4a   : > { %914 = vmatprep.subr.bf16.mxu0 %v2191_v20 }
  0x4c   : > { %633 = vmatmul.mubr.bf16.vlgmr.msra.gmra.mxu0 %v1976_v47  ;;  %997 = vmatmul.mubr.bf16.gmra.mxu1 %v2012_v57 }
  0x4d   : > { %642 = vmatprep.mubr.bf16.mxu0 %v1977_v42  ;;  %915 = vmatpush1.bf16.msra.mxu0 %v2194_v21 }
  0x4e   : > { %916 = vmatprep.subr.bf16.mxu0 %v2200_v23  ;;  %1857 = vmatprep.mubr.msk.bf16.mxu1 %vm883_vm0, %v2013_v58  ;;  %v1521_v58 = vld [vmem:[%s2884_s6 + $0x48] sm:$0xff] }
  0x51   : > { %917 = vmatpush1.bf16.msra.mxu0 %v2207_v25 }
  0x52   : > { %918 = vmatprep.subr.bf16.mxu0 %v2211_v26 }
  0x54   : > { %643 = vmatmul.mubr.bf16.gmra.mxu0 %v1979_v45  ;;  %1007 = vmatmul.mubr.bf16.gmra.mxu1 %v2015_v59 }
  0x55   : > { %652 = vmatprep.mubr.bf16.mxu0 %v1980_v38  ;;  %919 = vmatpush1.bf16.msra.mxu0 %v2221_v29 }
  0x56   : > { %920 = vmatprep.subr.bf16.mxu0 %v2225_v30  ;;  %1858 = vmatprep.mubr.msk.bf16.mxu1 %vm883_vm0, %v2016_v60  ;;  %v1520_v60 = vld [vmem:[%s2884_s6 + $0x40] sm:$0xff] }
  0x59   : > { %921 = vmatpush1.bf16.msra.mxu0 %v2235_v33 }
  0x5a   : > { %922 = vmatprep.subr.bf16.mxu0 %v1983_v34 }
  0x5c   : > { %653 = vmatmul.mubr.bf16.gmra.mxu0 %v1982_v41  ;;  %1017 = vmatmul.mubr.bf16.gmra.mxu1 %v2018_v61 }
  0x5d   : > { %662 = vmatprep.mubr.bf16.mxu0 %v1983_v34  ;;  %923 = vmatpush1.bf16.msra.mxu0 %v1985_v37  ;;  %v1316_v34 = vld [vmem:[%s2882_s4 + $0x80] sm:$0xff] }
  0x5e   : > { %924 = vmatprep.subr.bf16.mxu0 %v1980_v38  ;;  %1859 = vmatprep.mubr.msk.bf16.mxu1 %vm883_vm0, %v2019_v62  ;;  %v1318_v38 = vld [vmem:[%s2882_s4 + $0x90] sm:$0xff]  ;;  %v1523_v62 = vld [vmem:[%s2884_s6 + $0x58] sm:$0xff] }
  0x61   : > { %925 = vmatpush1.bf16.msra.mxu0 %v1982_v41 }
  0x62   : > { %926 = vmatprep.subr.bf16.mxu0 %v1977_v42  ;;  %v1513_v42 = vld [vmem:[%s2884_s6 + $0x8] sm:$0xff] }
  0x64   : > { %663 = vmatmul.mubr.bf16.gmra.mxu0 %v1985_v37  ;;  %1027 = vmatmul.mubr.bf16.gmra.mxu1 %v2021_v63 }
  0x65   : > { %672 = vmatprep.mubr.bf16.mxu0 %v2225_v30  ;;  %927 = vmatpush1.bf16.msra.mxu0 %v1979_v45 }
  0x66   : > { %928 = vmatprep.subr.bf16.mxu0 %v2169_v13  ;;  %1860 = vmatprep.mubr.msk.bf16.mxu1 %vm883_vm0, %v2022_v0  ;;  %v1304_v13 = vld [vmem:[%s2882_s4 + $0x20] sm:$0xff]  ;;  %v1522_v0 = vld [vmem:[%s2884_s6 + $0x50] sm:$0xff] }
  0x67   : > { %1343 = vperm.xlu0 %1924, %v1304_v13  }
  0x69   : > { %929 = vmatpush1.bf16.msra.mxu0 %v1976_v47 }
  0x6a   : > { %942 = vmatprep.subr.bf16.mxu0 %v2001_v48 }
  0x6b   : > { %1353 = vperm.xlu0 %1924, %v1306_v16   ;;  %v1530_v16 = vld [vmem:[%s2884_s6 + $0x90] sm:$0xff] }
  0x6c   : > { %673 = vmatmul.mubr.bf16.gmra.mxu0 %v2235_v33  ;;  %1037 = vmatmul.mubr.bf16.gmra.mxu1 %v2024_v1 }
  0x6d   : > { %682 = vmatprep.mubr.bf16.mxu0 %v2211_v26  ;;  %943 = vmatpush2.bf16.msra.mxu0 %v2003_v49  ;;  %v1315_v26 = vld [vmem:[%s2882_s4 + $0x78] sm:$0xff] }
  0x6e   : > { %944 = vmatprep.subr.bf16.mxu0 %v1998_v50  ;;  %1881 = vmatprep.mubr.msk.bf16.mxu1 %vm883_vm0, %v2030_v4  ;;  %v1524_v4 = vld [vmem:[%s2884_s6 + $0x60] sm:$0xff] }
  0x6f   : > { %1363 = vperm.xlu0 %1924, %v1308_v19  }
  0x71   : > { %945 = vmatpush2.bf16.msra.mxu0 %v2000_v51 }
  0x74   : > { %683 = vmatmul.mubr.bf16.gmra.mxu0 %v2221_v29 }
  0x75   : > { %692 = vmatprep.mubr.bf16.mxu0 %v2200_v23 }
  0x7c   : > { %693 = vmatmul.mubr.bf16.gmra.mxu0 %v2207_v25 }
  0x7d   : > { %702 = vmatprep.mubr.bf16.mxu0 %v2191_v20  ;;  %v1311_v20 = vld [vmem:[%s2882_s4 + $0x58] sm:$0xff] }
  0x7e   : > { %1378 = vperm.xlu1 %1925, %v1311_v20  }
  0x82   : > { %1388 = vperm.xlu1 %1925, %v1313_v22  }
  0x84   : > { %703 = vmatmul.mubr.bf16.gmra.mxu0 %v2194_v21  ;;  %v1310_v21 = vld [vmem:[%s2882_s4 + $0x50] sm:$0xff] }
  0x85   : > { %712 = vmatprep.mubr.bf16.mxu0 %v1998_v50  ;;  %1373 = vperm.xlu0 %1924, %v1310_v21   ;;  %v1517_v50 = vld [vmem:[%s2884_s6 + $0x28] sm:$0xff] }
  0x86   : > { %1398 = vperm.xlu1 %1925, %v1315_v26  }
  0x89   : > { %1383 = vperm.xlu0 %1924, %v1312_v24  }
  0x8a   : > { %1408 = vperm.xlu1 %1925, %v1317_v32  }
  0x8c   : > { %713 = vmatmul.mubr.bf16.gmra.mxu0 %v2000_v51 }
  0x8d   : > { %722 = vmatprep.mubr.bf16.mxu0 %v2001_v48  ;;  %1393 = vperm.xlu0 %1924, %v1314_v28   ;;  %v1514_v48 = vld [vmem:[%s2884_s6 + $0x10] sm:$0xff] }
  0x8e   : > { %1418 = vperm.xlu1 %1925, %v1319_v36  }
  0x91   : > { %1403 = vperm.xlu0 %1924, %v1316_v34  }
  0x92   : > { %1539 = vperm.xlu1 %1925, %v1513_v42  }
  0x94   : > { %723 = vmatmul.mubr.bf16.gmra.mxu0 %v2003_v49 }
  0x95   : > { %1851 = vmatprep.mubr.msk.bf16.mxu0 %vm883_vm0, %v2027_v3  ;;  %1413 = vperm.xlu0 %1924, %v1318_v38  }
  0x96   : > { %1549 = vperm.xlu1 %1925, %v1515_v46  }
  0x99   : > { %1534 = vperm.xlu0 %1924, %v1512_v44  }
  0x9a   : > { %1559 = vperm.xlu1 %1925, %v1517_v50  }
  0x9c   : > { %947 = vmatmul.mubr.bf16.vlgmr.msra.gmra.mxu0 %v2025_v2  ;;  %v1525_v2 = vld [vmem:[%s2884_s6 + $0x68] sm:$0xff] }
  0x9d   : > { %1852 = vmatprep.mubr.msk.bf16.mxu0 %vm883_vm0, %v2031_v8  ;;  %1544 = vperm.xlu0 %1924, %v1514_v48   ;;  %v1526_v8 = vld [vmem:[%s2884_s6 + $0x70] sm:$0xff] }
  0x9e   : > { %1569 = vperm.xlu1 %1925, %v1519_v54  }
  0xa1   : > { %1554 = vperm.xlu0 %1924, %v1516_v52  }
  0xa2   : > { %1579 = vperm.xlu1 %1925, %v1521_v58  }
  0xa4   : > { %957 = vmatmul.mubr.bf16.gmra.mxu0 %v2035_v11 }
  0xa5   : > { %1853 = vmatprep.mubr.msk.bf16.mxu0 %vm883_vm0, %v2037_v14  ;;  %1564 = vperm.xlu0 %1924, %v1518_v56   ;;  %v1531_v14 = vld [vmem:[%s2884_s6 + $0x98] sm:$0xff] }
  0xa6   : > { %1589 = vperm.xlu1 %1925, %v1523_v62   ;;  %v1422_v62 = vlaneseq }
  0xa9   : > { %1574 = vperm.xlu0 %1924, %v1520_v60  }
  0xaa   : > { %1599 = vperm.xlu1 %1925, %v1525_v2   ;;  %v2045_v2 = vld [vmem:[%s2880_s2 + $0x30] ss:$8 sps:$4 sm:$0xff]  }
  0xac   : > { %967 = vmatmul.mubr.bf16.gmra.mxu0 %v2041_v17 }
  0xad   : > { %1584 = vperm.xlu0 %1924, %v1522_v0  }
  0xae   : > { %1609 = vperm.xlu1 %1925, %v1527_v6  }
  0xb1   : > { %1594 = vperm.xlu0 %1924, %v1524_v4   ;;  %v2046_v4 = vld [vmem:[%s2880_s2 + $0x44] ss:$8 sps:$4 sm:$0xff]  }
  0xb2   : > { %1619 = vperm.xlu1 %1925, %v1529_v10  }
  0xb5   : > { %1604 = vperm.xlu0 %1924, %v1526_v8   ;;  %v1320_v8 = vld [vmem:[%s2883_s5] sm:$0x3] }
  0xb6   : > { %1629 = vperm.xlu1 %1925, %v1531_v14  }
  0xb9   : > { %1614 = vperm.xlu0 %1924, %v1528_v12  }
  0xbd   : > { %1624 = vperm.xlu0 %1924, %v1530_v16  }
 0x10c   : > { %v2403_v23 = vpop.f32.mrf.mxu0 }
 0x10e   : > { %v2408_v25 = vpop.f32.mrf.mxu0 }
 0x110   : > { %v2413_v27 = vpop.f32.mrf.mxu0 }
 0x111   : > { %v753_v29 = vpack.c.bf16 %v2413_v27, %v2403_v23 }
 0x112   : > { %v2420_v30 = vpop.f32.mrf.mxu0 }
 0x113   : > { %v754_v31 = vpack.c.bf16 %v2420_v30, %v2408_v25  ;;  %v2033_v25 = vld [vmem:[%s2880_s2 + $0x14] ss:$8 sps:$4 sm:$0xff]   ;;  %v2552_v30 = vpop.permute.xlu0 %1323 }
 0x114   : > { %v2427_v33 = vpop.f32.mrf.mxu0 }
 0x116   : > { %v2432_v35 = vpop.f32.mrf.mxu0 }
 0x117   : > { %v2557_v27 = vpop.permute.xlu0 %1328 }
 0x118   : > { %v2437_v37 = vpop.f32.mrf.mxu0 }
 0x119   : > { %v755_v39 = vpack.c.bf16 %v2437_v37, %v2427_v33  ;;  %v2028_v33 = vld [vmem:[%s2880_s2] ss:$8 sps:$4 sm:$0xff]   ;;  %v2547_v37 = vpop.permute.xlu1 %1333 }
 0x11a   : > { %v2444_v40 = vpop.f32.mrf.mxu0 }
 0x11b   : > { %v756_v41 = vpack.c.bf16 %v2444_v40, %v2432_v35  ;;  %v2567_v40 = vpop.permute.xlu0 %1343 }
 0x11c   : > { %v2451_v43 = vpop.f32.mrf.mxu0 }
 0x11d   : > { %v2554_v23 = vpop.permute.xlu1 %1338 }
 0x11e   : > { %v2456_v45 = vpop.f32.mrf.mxu0 }
 0x120   : > { %v2461_v47 = vpop.f32.mrf.mxu0 }
 0x121   : > { %v757_v60 = vpack.c.bf16 %v2461_v47, %v2451_v43 }
 0x122   : > { %v2466_v49 = vpop.f32.mrf.mxu0 }
 0x123   : > { %v758_v56 = vpack.c.bf16 %v2466_v49, %v2456_v45  ;;  %v2572_v49 = vpop.permute.xlu0 %1353 }
 0x124   : > { %v2471_v51 = vpop.f32.mrf.mxu0 }
 0x126   : > { %v2476_v53 = vpop.f32.mrf.mxu0 }
 0x128   : > { %v2481_v55 = vpop.f32.mrf.mxu0 }
 0x129   : > { %v759_v54 = vpack.c.bf16 %v2481_v55, %v2471_v51 }
 0x12a   : > { %v2486_v57 = vpop.f32.mrf.mxu0 }
 0x12b   : > { %v760_v50 = vpack.c.bf16 %v2486_v57, %v2476_v53  ;;  %v2042_v53 = vld [vmem:[%s2880_s2 + $0x20] ss:$8 sps:$4 sm:$0xff]   ;;  %v2043_v57 = vld [vmem:[%s2880_s2 + $0x34] ss:$8 sps:$4 sm:$0xff]  }
 0x12c   : > { %v674_v59 = vpop.f32.mrf.mxu0 }
 0x12e   : > { %v676_v61 = vpop.f32.mrf.mxu0 }
 0x130   : > { %v678_v63 = vpop.f32.mrf.mxu0 }
 0x131   : > { %v761_v48 = vpack.c.bf16 %v678_v63, %v674_v59 }
 0x132   : > { %v680_v1 = vpop.f32.mrf.mxu0 }
 0x133   : > { %v762_v44 = vpack.c.bf16 %v680_v1, %v676_v61  ;;  %v2582_v61 = vpop.permute.xlu0 %1363  ;;  %v1423_v1 = vshrl.u32 %v1422_v62, 7 }
 0x134   : > { %v684_v3 = vpop.f32.mrf.mxu0 }
 0x135   : > { %v1424_v6 = vsub.s32 0, %v1423_v1 }
 0x136   : > { %v686_v5 = vpop.f32.mrf.mxu0 }
 0x137   : > { %v2587_v0 = vpop.permute.xlu0 %1373 }
 0x138   : > { %v688_v7 = vpop.f32.mrf.mxu0 }
 0x139   : > { %v763_v42 = vpack.c.bf16 %v688_v7, %v684_v3  ;;  %v1428_v7 = vsub.s32 1, %v1423_v1 }
 0x13a   : > { %v690_v9 = vpop.f32.mrf.mxu0 }
 0x13b   : > { %v764_v36 = vpack.c.bf16 %v690_v9, %v686_v5  ;;  %v2597_v5 = vpop.permute.xlu0 %1383  ;;  %v2609_v12 = vrot.slane %v1320_v8, %v1428_v7 }
 0x13c   : > { %v694_v11 = vpop.f32.mrf.mxu0 }
 0x13e   : > { %v696_v13 = vpop.f32.mrf.mxu0 }
 0x13f   : > { %v2605_v10 = vpop.permute.xlu0 %1393 }
 0x140   : > { %v698_v15 = vpop.f32.mrf.mxu0 }
 0x141   : > { %v765_v34 = vpack.c.bf16 %v698_v15, %v694_v11  ;;  %v2607_v11 = vrot.slane %v1320_v8, %v1424_v6  ;;  %v2049_v15 = vld [vmem:[%s2880_s2 + $0x54] ss:$8 sps:$4 sm:$0xff]  }
 0x142   : > { %v700_v17 = vpop.f32.mrf.mxu0 }
 0x143   : > { %v766_v28 = vpack.c.bf16 %v700_v17, %v696_v13  ;;  %v2048_v13 = vld [vmem:[%s2880_s2 + $0x40] ss:$8 sps:$4 sm:$0xff]  }
 0x144   : > { %v704_v18 = vpop.f32.mrf.mxu0 }
 0x146   : > { %v706_v19 = vpop.f32.mrf.mxu0 }
 0x148   : > { %v708_v20 = vpop.f32.mrf.mxu0 }
 0x149   : > { %v767_v24 = vpack.c.bf16 %v708_v20, %v704_v18  ;;  %v1404_v18 = vpop.permute.xlu0 %1403 }
 0x14a   : > { %v710_v21 = vpop.f32.mrf.mxu0  ;;  %v2627_v20 = vmul.f32 %v2609_v12, %v1404_v18 }
 0x14b   : > { %v768_v22 = vpack.c.bf16 %v710_v21, %v706_v19  ;;  %v2624_v19 = vmul.f32 %v2607_v11, %v1404_v18 }
 0x14c   : > { %v714_v26 = vpop.f32.mrf.mxu0  ;;  %2889 = vst [vmem:[#allocation5_spill] sm:$0xff] %v2627_v20  ;;  %v1436_v20 = vmul.f32 %v2607_v11, %v2547_v37 }
 0x14d   : > { %1167 = vmatprep.subr.bf16.mxu1 %v768_v22  ;;  %2888 = vst [vmem:[#allocation4_spill] sm:$0xff] %v2624_v19 }
 0x14e   : > { %1168 = vmatpush1.bf16.msra.mxu1 %v767_v24  ;;  %v716_v32 = vpop.f32.mrf.mxu0 }
 0x14f   : > { %1169 = vmatprep.subr.bf16.mxu1 %v766_v28 }
 0x150   : > { %v718_v38 = vpop.f32.mrf.mxu0 }
 0x151   : > { %v769_v35 = vpack.c.bf16 %v718_v38, %v714_v26  ;;  %v1414_v26 = vpop.permute.xlu0 %1413  ;;  %v2054_v38 = vld [vmem:[%s2880_s2 + $0x60] ss:$8 sps:$4 sm:$0xff]  }
 0x152   : > { %1170 = vmatpush1.bf16.msra.mxu1 %v765_v34  ;;  %v720_v46 = vpop.f32.mrf.mxu0  ;;  %v2637_v28 = vmul.f32 %v2607_v11, %v1414_v26  ;;  %v2051_v34 = vld [vmem:[%s2880_s2 + $0x50] ss:$8 sps:$4 sm:$0xff]  }
 0x153   : > { %1171 = vmatprep.subr.bf16.mxu1 %v764_v36  ;;  %v770_v47 = vpack.c.bf16 %v720_v46, %v716_v32  ;;  %v2640_v32 = vmul.f32 %v2609_v12, %v1414_v26  ;;  %v2052_v36 = vld [vmem:[%s2880_s2 + $0x64] ss:$8 sps:$4 sm:$0xff]  }
 0x154   : > { %v724_v52 = vpop.f32.mrf.mxu0  ;;  %2892 = vst [vmem:[#allocation8_spill] sm:$0xff] %v2637_v28  ;;  %v2058_v46 = vld [vmem:[%s2880_s2 + $0x84] ss:$8 sps:$4 sm:$0xff]  }
 0x155   : > { %2893 = vst [vmem:[#allocation9_spill] sm:$0xff] %v2640_v32  ;;  %v1434_v32 = vmul.f32 %v2607_v11, %v2557_v27 }
 0x156   : > { %1172 = vmatpush1.bf16.msra.mxu1 %v763_v42  ;;  %v726_v58 = vpop.f32.mrf.mxu0  ;;  %v2055_v42 = vld [vmem:[%s2880_s2 + $0x74] ss:$8 sps:$4 sm:$0xff]  }
 0x157   : > { %1173 = vmatprep.subr.bf16.mxu1 %v762_v44  ;;  %v2057_v44 = vld [vmem:[%s2880_s2 + $0x70] ss:$8 sps:$4 sm:$0xff]  }
 0x158   : > { %v728_v59 = vpop.f32.mrf.mxu0 }
 0x159   : > { %v771_v43 = vpack.c.bf16 %v728_v59, %v724_v52  ;;  %v2063_v52 = vld [vmem:[%s2880_s2 + $0x90] ss:$8 sps:$4 sm:$0xff]  }
 0x15a   : > { %1174 = vmatpush1.bf16.msra.mxu1 %v761_v48  ;;  %v730_v51 = vpop.f32.mrf.mxu0  ;;  %v2060_v48 = vld [vmem:[%s2880_s2 + $0x80] ss:$8 sps:$4 sm:$0xff]  }
 0x15b   : > { %1175 = vmatprep.subr.bf16.mxu1 %v760_v50  ;;  %v772_v45 = vpack.c.bf16 %v730_v51, %v726_v58  ;;  %v2061_v50 = vld [vmem:[%s2880_s2 + $0x94] ss:$8 sps:$4 sm:$0xff]  }
 0x15c   : > { %v948_v8 = vpop.f32.mrf.mxu0 }
 0x15e   : > { %1176 = vmatpush1.bf16.msra.mxu1 %v759_v54  ;;  %v2673_v54 = vpop.f32.mrf.mxu1 }
 0x15f   : > { %1177 = vmatprep.subr.bf16.mxu1 %v758_v56 }
 0x160   : > { %v2675_v56 = vpop.f32.mrf.mxu1 }
 0x162   : > { %1178 = vmatpush1.bf16.msra.mxu1 %v757_v60  ;;  %v2677_v58 = vpop.f32.mrf.mxu1 }
 0x163   : > { %1179 = vmatprep.subr.bf16.mxu1 %v756_v41 }
 0x164   : > { %v2679_v60 = vpop.f32.mrf.mxu1 }
 0x166   : > { %1180 = vmatpush1.bf16.msra.mxu1 %v755_v39  ;;  %v2039_v39 = vld [vmem:[%s2880_s2 + $0x24] ss:$8 sps:$4 sm:$0xff]   ;;  %v2681_v59 = vpop.f32.mrf.mxu1 }
 0x167   : > { %1181 = vmatprep.subr.bf16.mxu1 %v754_v31  ;;  %v2562_v31 = vpop.permute.xlu1 %1348 }
 0x168   : > { %v2683_v51 = vpop.f32.mrf.mxu1 }
 0x16a   : > { %1182 = vmatpush1.bf16.msra.mxu1 %v753_v29  ;;  %v2036_v29 = vld [vmem:[%s2880_s2 + $0x10] ss:$8 sps:$4 sm:$0xff]  }
 0x16b   : > { %1195 = vmatprep.subr.bf16.mxu1 %v772_v45  ;;  %v2569_v41 = vpop.permute.xlu1 %1358  ;;  %v2685_v45 = vpop.f32.mrf.mxu1 }
 0x16e   : > { %1196 = vmatpush2.bf16.msra.mxu1 %v771_v43  ;;  %v2687_v43 = vpop.f32.mrf.mxu1 }
 0x16f   : > { %1197 = vmatprep.subr.bf16.mxu1 %v770_v47  ;;  %v2577_v55 = vpop.permute.xlu1 %1368 }
 0x170   : > { %v2689_v47 = vpop.f32.mrf.mxu1 }
 0x172   : > { %1198 = vmatpush2.bf16.msra.mxu1 %v769_v35  ;;  %v2691_v35 = vpop.f32.mrf.mxu1 }
 0x173   : > { %v2584_v63 = vpop.permute.xlu1 %1378 }
 0x175   : > { %1200 = vmatmul.mubr.bf16.vlgmr.msra.gmra.mxu1 %v2028_v33  ;;  %v2693_v33 = vpop.f32.mrf.mxu1 }
 0x176   : > { %1882 = vmatprep.mubr.msk.bf16.mxu1 %vm883_vm0, %v2033_v25 }
 0x177   : > { %v2592_v3 = vpop.permute.xlu1 %1388  ;;  %v2695_v25 = vpop.f32.mrf.mxu1 }
 0x17b   : > { %v2602_v9 = vpop.permute.xlu1 %1398 }
 0x17d   : > { %1210 = vmatmul.mubr.bf16.gmra.mxu1 %v2036_v29  ;;  %v2697_v29 = vpop.f32.mrf.mxu1 }
 0x17e   : > { %1883 = vmatprep.mubr.msk.bf16.mxu1 %vm883_vm0, %v2039_v39 }
 0x17f   : > { %v1409_v14 = vpop.permute.xlu1 %1408  ;;  %v2699_v39 = vpop.f32.mrf.mxu1 }
 0x180   : > { %v2618_v16 = vmul.f32 %v2607_v11, %v1409_v14  ;;  %v2621_v17 = vmul.f32 %v2609_v12, %v1409_v14  ;;  %v950_v14 = vpop.f32.mrf.mxu0 }
 0x182   : > { %2886 = vst [vmem:[#allocation2_spill] sm:$0xff] %v2618_v16  ;;  %2887 = vst [vmem:[#allocation3_spill] sm:$0xff] %v2621_v17  ;;  %v952_v18 = vpop.f32.mrf.mxu0 }
 0x183   : > { %v1419_v21 = vpop.permute.xlu1 %1418 }
 0x184   : > { %v2631_v22 = vmul.f32 %v2607_v11, %v1419_v21  ;;  %v2634_v24 = vmul.f32 %v2609_v12, %v1419_v21  ;;  %v954_v26 = vpop.f32.mrf.mxu0 }
 0x185   : > { %1220 = vmatmul.mubr.bf16.gmra.mxu1 %v2042_v53  ;;  %v2701_v53 = vpop.f32.mrf.mxu1 }
 0x186   : > { %1884 = vmatprep.mubr.msk.bf16.mxu1 %vm883_vm0, %v2043_v57  ;;  %2890 = vst [vmem:[#allocation6_spill] sm:$0xff] %v2631_v22  ;;  %2891 = vst [vmem:[#allocation7_spill] sm:$0xff] %v2634_v24 }
 0x187   : > { %v2703_v57 = vpop.f32.mrf.mxu1  ;;  %v1540_v16 = vpop.permute.xlu1 %1539 }
 0x189   : > { %v2705_v62 = vpop.f32.mrf.mxu1 }
 0x18b   : > { %v2707_v1 = vpop.f32.mrf.mxu1 }
 0x18d   : > { %1230 = vmatmul.mubr.bf16.gmra.mxu1 %v2045_v2  ;;  %v2709_v2 = vpop.f32.mrf.mxu1 }
 0x18e   : > { %1885 = vmatprep.mubr.msk.bf16.mxu1 %vm883_vm0, %v2046_v4 }
 0x18f   : > { %v2711_v4 = vpop.f32.mrf.mxu1 }
 0x191   : > { %v2713_v6 = vpop.f32.mrf.mxu1 }
 0x193   : > { %v2715_v7 = vpop.f32.mrf.mxu1 }
 0x194   : > { %2894 = vst [vmem:[#allocation10_spill] sm:$0xff] %v2715_v7 }
 0x195   : > { %1240 = vmatmul.mubr.bf16.gmra.mxu1 %v2048_v13  ;;  %v2717_v13 = vpop.f32.mrf.mxu1 }
 0x196   : > { %1886 = vmatprep.mubr.msk.bf16.mxu1 %vm883_vm0, %v2049_v15  ;;  %2895 = vst [vmem:[#allocation11_spill] sm:$0xff] %v2717_v13 }
 0x197   : > { %v2719_v15 = vpop.f32.mrf.mxu1 }
 0x198   : > { %2896 = vst [vmem:[#allocation12_spill] sm:$0xff] %v2719_v15 }
 0x199   : > { %v2721_v21 = vpop.f32.mrf.mxu1 }
 0x19a   : > { %2897 = vst [vmem:[#allocation13_spill] sm:$0xff] %v2721_v21 }
 0x19d   : > { %1250 = vmatmul.mubr.bf16.gmra.mxu1 %v2051_v34  ;;  %v2723_v34 = vpop.f32.mrf.mxu1 }
 0x19e   : > { %1887 = vmatprep.mubr.msk.bf16.mxu1 %vm883_vm0, %v2052_v36  ;;  %2898 = vst [vmem:[#allocation14_spill] sm:$0xff] %v2723_v34  ;;  %v958_v36 = vpop.f32.mrf.mxu0  ;;  %v1535_v34 = vpop.permute.xlu0 %1534 }
 0x1a5   : > { %1260 = vmatmul.mubr.bf16.gmra.mxu1 %v2054_v38  ;;  %v2725_v38 = vpop.f32.mrf.mxu1 }
 0x1a6   : > { %1888 = vmatprep.mubr.msk.bf16.mxu1 %vm883_vm0, %v2055_v42  ;;  %2899 = vst [vmem:[#allocation15_spill] sm:$0xff] %v2725_v38  ;;  %v960_v42 = vpop.f32.mrf.mxu0 }
 0x1ad   : > { %1270 = vmatmul.mubr.bf16.gmra.mxu1 %v2057_v44  ;;  %v2727_v44 = vpop.f32.mrf.mxu1 }
 0x1ae   : > { %1889 = vmatprep.mubr.msk.bf16.mxu1 %vm883_vm0, %v2058_v46  ;;  %2900 = vst [vmem:[#allocation16_spill] sm:$0xff] %v2727_v44  ;;  %v1432_v46 = vmul.f32 %v2607_v11, %v2552_v30 }
 0x1b5   : > { %1280 = vmatmul.mubr.bf16.gmra.mxu1 %v2060_v48 }
 0x1b6   : > { %1890 = vmatprep.mubr.msk.bf16.mxu1 %vm883_vm0, %v2061_v50  ;;  %v962_v50 = vpop.f32.mrf.mxu0 }
 0x1b8   : > { %v964_v21 = vpop.f32.mrf.mxu0 }
 0x1ba   : > { %v968_v13 = vpop.f32.mrf.mxu0 }
 0x1bd   : > { %1290 = vmatmul.mubr.bf16.gmra.mxu1 %v2063_v52  ;;  %v1433_v52 = vmul.f32 %v2609_v12, %v2552_v30  ;;  %v1435_v30 = vmul.f32 %v2609_v12, %v2557_v27 }
 0x235   : > { %v1201_v48 = vpop.f32.mrf.mxu1 }
 0x236   : > { %v1202_v24 = vadd.f32 %v1201_v48, %v948_v8 }
 0x237   : > { %v1203_v22 = vpop.f32.mrf.mxu1 }
 0x238   : > { %v1472_v28 = vadd.f32 %v1432_v46, %v1202_v24  ;;  %v1204_v38 = vadd.f32 %v1203_v22, %v950_v14 }
 0x239   : > { %v1205_v44 = vpop.f32.mrf.mxu1 }
 0x23a   : > { %v1632_v8 = vadd.f32 %v1535_v34, %v1472_v28  ;;  %v1473_v48 = vadd.f32 %v1433_v52, %v1204_v38  ;;  %v1206_v17 = vadd.f32 %v1205_v44, %v952_v18  ;;  %v1437_v18 = vmul.f32 %v2609_v12, %v2547_v37  ;;  %v1545_v38 = vpop.permute.xlu0 %1544 }
 0x23b   : > { %v1207_v15 = vpop.f32.mrf.mxu1  ;;  %v1438_v44 = vmul.f32 %v2607_v11, %v2554_v23  ;;  %v1439_v37 = vmul.f32 %v2609_v12, %v2554_v23  ;;  %v1441_v23 = vmul.f32 %v2609_v12, %v2567_v40 }
 0x23c   : > { %1672 = vst [vmem:[%s2739_s29] sm:$0xff] %v1632_v8  ;;  %v1633_v22 = vadd.f32 %v1535_v34, %v1473_v48  ;;  %v1474_v24 = vadd.f32 %v1434_v32, %v1206_v17  ;;  %v1208_v14 = vadd.f32 %v1207_v15, %v954_v26  ;;  %v970_v26 = vpop.f32.mrf.mxu0  ;;  %v1550_v48 = vpop.permute.xlu1 %1549 }
 0x23d   : > { %v1211_v46 = vpop.f32.mrf.mxu1 }
 0x23e   : > { %1673 = vst [vmem:[%s2739_s29 + $0x8] sm:$0xff] %v1633_v22  ;;  %v1634_v7 = vadd.f32 %v1540_v16, %v1474_v24  ;;  %v1475_v19 = vadd.f32 %v1435_v30, %v1208_v14  ;;  %v1212_v27 = vadd.f32 %v1211_v46, %v958_v36  ;;  %v1440_v22 = vmul.f32 %v2607_v11, %v2567_v40 }
 0x23f   : > { %v1213_v28 = vpop.f32.mrf.mxu1  ;;  %v1443_v40 = vmul.f32 %v2609_v12, %v2562_v31 }
 0x240   : > { %1674 = vst [vmem:[%s2739_s29 + $0x10] sm:$0xff] %v1634_v7  ;;  %v1635_v34 = vadd.f32 %v1540_v16, %v1475_v19  ;;  %v1476_v17 = vadd.f32 %v1436_v20, %v1212_v27  ;;  %v1214_v32 = vadd.f32 %v1213_v28, %v960_v42  ;;  %v972_v42 = vpop.f32.mrf.mxu0  ;;  %v1555_v27 = vpop.permute.xlu0 %1554 }
 0x241   : > { %v1215_v15 = vpop.f32.mrf.mxu1 }
 0x242   : > { %1675 = vst [vmem:[%s2739_s29 + $0x18] sm:$0xff] %v1635_v34  ;;  %v1636_v52 = vadd.f32 %v1545_v38, %v1476_v17  ;;  %v1477_v30 = vadd.f32 %v1437_v18, %v1214_v32  ;;  %v1216_v36 = vadd.f32 %v1215_v15, %v962_v50  ;;  %v974_v34 = vpop.f32.mrf.mxu0  ;;  %v1442_v17 = vmul.f32 %v2607_v11, %v2562_v31 }
 0x243   : > { %v1217_v8 = vpop.f32.mrf.mxu1  ;;  %v1445_v31 = vmul.f32 %v2609_v12, %v2572_v49 }
 0x244   : > { %1676 = vst [vmem:[%s2739_s29 + $0x20] sm:$0xff] %v1636_v52  ;;  %v1637_v16 = vadd.f32 %v1545_v38, %v1477_v30  ;;  %v1478_v19 = vadd.f32 %v1438_v44, %v1216_v36  ;;  %v1218_v20 = vadd.f32 %v1217_v8, %v964_v21 }
 0x245   : > { %v1221_v7 = vpop.f32.mrf.mxu1 }
 0x246   : > { %1677 = vst [vmem:[%s2739_s29 + $0x28] sm:$0xff] %v1637_v16  ;;  %v1638_v24 = vadd.f32 %v1550_v48, %v1478_v19  ;;  %v1479_v14 = vadd.f32 %v1439_v37, %v1218_v20  ;;  %v1222_v50 = vadd.f32 %v1221_v7, %v968_v13  ;;  %v1444_v37 = vmul.f32 %v2607_v11, %v2572_v49 }
 0x247   : > { %v1223_v46 = vpop.f32.mrf.mxu1  ;;  %v1447_v49 = vmul.f32 %v2609_v12, %v2569_v41 }
 0x248   : > { %1678 = vst [vmem:[%s2739_s29 + $0x30] sm:$0xff] %v1638_v24  ;;  %v1639_v28 = vadd.f32 %v1550_v48, %v1479_v14  ;;  %v1480_v18 = vadd.f32 %v1440_v22, %v1222_v50  ;;  %v1224_v21 = vadd.f32 %v1223_v46, %v970_v26  ;;  %v1560_v26 = vpop.permute.xlu1 %1559  ;;  %v1565_v24 = vpop.permute.xlu0 %1564  ;;  %v1446_v50 = vmul.f32 %v2607_v11, %v2569_v41 }
 0x249   : > { %v1225_v38 = vpop.f32.mrf.mxu1  ;;  %v1449_v41 = vmul.f32 %v2609_v12, %v2582_v61 }
 0x24a   : > { %1679 = vst [vmem:[%s2739_s29 + $0x38] sm:$0xff] %v1639_v28  ;;  %v1640_v32 = vadd.f32 %v1555_v27, %v1480_v18  ;;  %v1481_v15 = vadd.f32 %v1441_v23, %v1224_v21  ;;  %v1226_v13 = vadd.f32 %v1225_v38, %v972_v42 }
 0x24b   : > { %v1227_v44 = vpop.f32.mrf.mxu1 }
 0x24c   : > { %1680 = vst [vmem:[%s2739_s29 + $0x40] sm:$0xff] %v1640_v32  ;;  %v1641_v52 = vadd.f32 %v1555_v27, %v1481_v15  ;;  %v1482_v30 = vadd.f32 %v1442_v17, %v1226_v13  ;;  %v1228_v36 = vadd.f32 %v1227_v44, %v974_v34  ;;  %v1570_v21 = vpop.permute.xlu1 %1569  ;;  %v1448_v34 = vmul.f32 %v2607_v11, %v2582_v61 }
 0x24d   : > { %v1231_v8 = vpop.f32.mrf.mxu1  ;;  %v1451_v61 = vmul.f32 %v2609_v12, %v2577_v55 }
 0x24e   : > { %1681 = vst [vmem:[%s2739_s29 + $0x48] sm:$0xff] %v1641_v52  ;;  %v1642_v48 = vadd.f32 %v1560_v26, %v1482_v30  ;;  %v1483_v16 = vadd.f32 %v1443_v40, %v1228_v36  ;;  %v1232_v19 = vadd.f32 %v1231_v8, %v2673_v54  ;;  %v1575_v40 = vpop.permute.xlu0 %1574  ;;  %v1450_v30 = vmul.f32 %v2607_v11, %v2577_v55 }
 0x24f   : > { %v1233_v20 = vpop.f32.mrf.mxu1  ;;  %v1453_v55 = vmul.f32 %v2609_v12, %v2587_v0 }
 0x250   : > { %1682 = vst [vmem:[%s2739_s29 + $0x50] sm:$0xff] %v1642_v48  ;;  %v1643_v7 = vadd.f32 %v1560_v26, %v1483_v16  ;;  %v1484_v42 = vadd.f32 %v1444_v37, %v1232_v19  ;;  %v1234_v22 = vadd.f32 %v1233_v20, %v2675_v56  ;;  %v1580_v16 = vpop.permute.xlu1 %1579  ;;  %v1452_v20 = vmul.f32 %v2607_v11, %v2587_v0 }
 0x251   : > { %v1235_v14 = vpop.f32.mrf.mxu1  ;;  %v1455_v0 = vmul.f32 %v2609_v12, %v2584_v63 }
 0x252   : > { %1683 = vst [vmem:[%s2739_s29 + $0x58] sm:$0xff] %v1643_v7  ;;  %v1644_v46 = vadd.f32 %v1565_v24, %v1484_v42  ;;  %v1485_v23 = vadd.f32 %v1445_v31, %v1234_v22  ;;  %v1236_v54 = vadd.f32 %v1235_v14, %v2677_v58  ;;  %v1585_v14 = vpop.permute.xlu0 %1584 }
 0x253   : > { %v1237_v27 = vpop.f32.mrf.mxu1 }
 0x254   : > { %1684 = vst [vmem:[%s2739_s29 + $0x60] sm:$0xff] %v1644_v46  ;;  %v1645_v28 = vadd.f32 %v1565_v24, %v1485_v23  ;;  %v1486_v18 = vadd.f32 %v1446_v50, %v1236_v54  ;;  %v1238_v56 = vadd.f32 %v1237_v27, %v2679_v60  ;;  %v1454_v46 = vmul.f32 %v2607_v11, %v2584_v63 }
 0x255   : > { %v1241_v38 = vpop.f32.mrf.mxu1  ;;  %v1457_v63 = vmul.f32 %v2609_v12, %v2597_v5 }
 0x256   : > { %1685 = vst [vmem:[%s2739_s29 + $0x68] sm:$0xff] %v1645_v28  ;;  %v1646_v17 = vadd.f32 %v1570_v21, %v1486_v18  ;;  %v1487_v32 = vadd.f32 %v1447_v49, %v1238_v56  ;;  %v1242_v58 = vadd.f32 %v1241_v38, %v2681_v59  ;;  %v1590_v18 = vpop.permute.xlu1 %1589 }
 0x257   : > { %v1243_v15 = vpop.f32.mrf.mxu1 }
 0x258   : > { %1686 = vst [vmem:[%s2739_s29 + $0x70] sm:$0xff] %v1646_v17  ;;  %v1647_v13 = vadd.f32 %v1570_v21, %v1487_v32  ;;  %v1488_v44 = vadd.f32 %v1448_v34, %v1242_v58  ;;  %v1244_v60 = vadd.f32 %v1243_v15, %v2683_v51  ;;  %v1456_v21 = vmul.f32 %v2607_v11, %v2597_v5  ;;  %v1595_v15 = vpop.permute.xlu0 %1594 }
 0x259   : > { %v1245_v52 = vpop.f32.mrf.mxu1  ;;  %v1459_v5 = vmul.f32 %v2609_v12, %v2592_v3 }
 0x25a   : > { %1687 = vst [vmem:[%s2739_s29 + $0x78] sm:$0xff] %v1647_v13  ;;  %v1648_v36 = vadd.f32 %v1575_v40, %v1488_v44  ;;  %v1489_v26 = vadd.f32 %v1449_v41, %v1244_v60  ;;  %v1246_v59 = vadd.f32 %v1245_v52, %v2685_v45  ;;  %v1458_v13 = vmul.f32 %v2607_v11, %v2592_v3 }
 0x25b   : > { %v1247_v8 = vpop.f32.mrf.mxu1  ;;  %v1461_v3 = vmul.f32 %v2609_v12, %v2605_v10 }
 0x25c   : > { %1688 = vst [vmem:[%s2739_s29 + $0x80] sm:$0xff] %v1648_v36  ;;  %v1649_v37 = vadd.f32 %v1575_v40, %v1489_v26  ;;  %v1490_v48 = vadd.f32 %v1450_v30, %v1246_v59  ;;  %v1248_v51 = vadd.f32 %v1247_v8, %v2687_v43  ;;  %v1600_v36 = vpop.permute.xlu1 %1599  ;;  %v1460_v59 = vmul.f32 %v2607_v11, %v2605_v10 }
 0x25d   : > { %v1251_v19 = vpop.f32.mrf.mxu1  ;;  %v1463_v10 = vmul.f32 %v2609_v12, %v2602_v9  ;;  %v2902_v12 = vld [vmem:[#allocation10_spill] sm:$0xff] }
 0x25e   : > { %1689 = vst [vmem:[%s2739_s29 + $0x88] sm:$0xff] %v1649_v37  ;;  %v1650_v31 = vadd.f32 %v1580_v16, %v1490_v48  ;;  %v1491_v7 = vadd.f32 %v1451_v61, %v1248_v51  ;;  %v1252_v45 = vadd.f32 %v1251_v19, %v2689_v47 }
 0x25f   : > { %v1253_v42 = vpop.f32.mrf.mxu1 }
 0x260   : > { %1690 = vst [vmem:[%s2739_s29 + $0x90] sm:$0xff] %v1650_v31  ;;  %v1651_v22 = vadd.f32 %v1580_v16, %v1491_v7  ;;  %v1492_v24 = vadd.f32 %v1452_v20, %v1252_v45  ;;  %v1254_v43 = vadd.f32 %v1253_v42, %v2691_v35  ;;  %v1605_v16 = vpop.permute.xlu0 %1604  ;;  %v1462_v20 = vmul.f32 %v2607_v11, %v2602_v9 }
 0x261   : > { %v1255_v50 = vpop.f32.mrf.mxu1 }
 0x262   : > { %1691 = vst [vmem:[%s2739_s29 + $0x98] sm:$0xff] %v1651_v22  ;;  %v1652_v23 = vadd.f32 %v1585_v14, %v1492_v24  ;;  %v1493_v54 = vadd.f32 %v1453_v55, %v1254_v43  ;;  %v1256_v47 = vadd.f32 %v1255_v50, %v2693_v33  ;;  %v1610_v22 = vpop.permute.xlu1 %1609 }
 0x263   : > { %v1257_v27 = vpop.f32.mrf.mxu1 }
 0x264   : > { %1692 = vst [vmem:[%s2739_s29 + $0xa0] sm:$0xff] %v1652_v23  ;;  %v1653_v49 = vadd.f32 %v1585_v14, %v1493_v54  ;;  %v1494_v28 = vadd.f32 %v1454_v46, %v1256_v47  ;;  %v1258_v35 = vadd.f32 %v1257_v27, %v2695_v25  ;;  %v2901_v46 = vld [vmem:[#allocation4_spill] sm:$0xff]  ;;  %v1615_v54 = vpop.permute.xlu0 %1614  ;;  %v2903_v27 = vld [vmem:[#allocation5_spill] sm:$0xff] }
 0x265   : > { %v1261_v56 = vpop.f32.mrf.mxu1 }
 0x266   : > { %1693 = vst [vmem:[%s2739_s29 + $0xa8] sm:$0xff] %v1653_v49  ;;  %v1654_v38 = vadd.f32 %v1590_v18, %v1494_v28  ;;  %v1495_v34 = vadd.f32 %v1455_v0, %v1258_v35  ;;  %v1262_v33 = vadd.f32 %v1261_v56, %v2697_v29  ;;  %v2904_v49 = vld [vmem:[#allocation11_spill] sm:$0xff] }
 0x267   : > { %v1263_v17 = vpop.f32.mrf.mxu1 }
 0x268   : > { %1694 = vst [vmem:[%s2739_s29 + $0xb0] sm:$0xff] %v1654_v38  ;;  %v1655_v32 = vadd.f32 %v1590_v18, %v1495_v34  ;;  %v1496_v58 = vadd.f32 %v1456_v21, %v1262_v33  ;;  %v1264_v25 = vadd.f32 %v1263_v17, %v2699_v39  ;;  %v2905_v18 = vld [vmem:[#allocation2_spill] sm:$0xff]  ;;  %v2906_v21 = vld [vmem:[#allocation12_spill] sm:$0xff]  ;;  %v1620_v34 = vpop.permute.xlu1 %1619 }
 0x269   : > { %v1265_v41 = vpop.f32.mrf.mxu1 }
 0x26a   : > { %1695 = vst [vmem:[%s2739_s29 + $0xb8] sm:$0xff] %v1655_v32  ;;  %v1656_v44 = vadd.f32 %v1595_v15, %v1496_v58  ;;  %v1497_v60 = vadd.f32 %v1457_v63, %v1264_v25  ;;  %v1266_v29 = vadd.f32 %v1265_v41, %v2701_v53  ;;  %v2907_v63 = vld [vmem:[#allocation3_spill] sm:$0xff]  ;;  %v2908_v58 = vld [vmem:[#allocation13_spill] sm:$0xff] }
 0x26b   : > { %v1267_v40 = vpop.f32.mrf.mxu1 }
 0x26c   : > { %1696 = vst [vmem:[%s2739_s29 + $0xc0] sm:$0xff] %v1656_v44  ;;  %v1657_v52 = vadd.f32 %v1595_v15, %v1497_v60  ;;  %v1498_v30 = vadd.f32 %v1458_v13, %v1266_v29  ;;  %v1268_v39 = vadd.f32 %v1267_v40, %v2703_v57  ;;  %v2909_v13 = vld [vmem:[#allocation8_spill] sm:$0xff]  ;;  %v2910_v60 = vld [vmem:[#allocation14_spill] sm:$0xff]  ;;  %v1625_v40 = vpop.permute.xlu0 %1624 }
 0x26d   : > { %v1271_v26 = vpop.f32.mrf.mxu1 }
 0x26e   : > { %1697 = vst [vmem:[%s2739_s29 + $0xc8] sm:$0xff] %v1657_v52  ;;  %v1658_v8 = vadd.f32 %v1600_v36, %v1498_v30  ;;  %v1499_v61 = vadd.f32 %v1459_v5, %v1268_v39  ;;  %v1272_v53 = vadd.f32 %v1271_v26, %v2705_v62  ;;  %v2911_v30 = vld [vmem:[#allocation9_spill] sm:$0xff] }
 0x26f   : > { %v1273_v37 = vpop.f32.mrf.mxu1 }
 0x270   : > { %1698 = vst [vmem:[%s2739_s29 + $0xd0] sm:$0xff] %v1658_v8  ;;  %v1659_v48 = vadd.f32 %v1600_v36, %v1499_v61  ;;  %v1500_v51 = vadd.f32 %v1460_v59, %v1272_v53  ;;  %v1274_v57 = vadd.f32 %v1273_v37, %v2707_v1  ;;  %v2912_v36 = vld [vmem:[#allocation15_spill] sm:$0xff]  ;;  %v2913_v61 = vld [vmem:[#allocation6_spill] sm:$0xff]  ;;  %v2914_v37 = vld [vmem:[#allocation16_spill] sm:$0xff] }
 0x271   : > { %v1275_v19 = vpop.f32.mrf.mxu1 }
 0x272   : > { %1699 = vst [vmem:[%s2739_s29 + $0xd8] sm:$0xff] %v1659_v48  ;;  %v1660_v31 = vadd.f32 %v1605_v16, %v1500_v51  ;;  %v1501_v62 = vadd.f32 %v1461_v3, %v1274_v57  ;;  %v1276_v7 = vadd.f32 %v1275_v19, %v2709_v2  ;;  %v1630_v48 = vpop.permute.xlu1 %1629  ;;  %v2915_v57 = vld [vmem:[#allocation7_spill] sm:$0xff] }
 0x273   : > { %v1277_v45 = vpop.f32.mrf.mxu1 }
 0x274   : > { %1700 = vst [vmem:[%s2739_s29 + $0xe0] sm:$0xff] %v1660_v31  ;;  %v1661_v42 = vadd.f32 %v1605_v16, %v1501_v62  ;;  %v1502_v1 = vadd.f32 %v1462_v20, %v1276_v7  ;;  %v1278_v55 = vadd.f32 %v1277_v45, %v2711_v4 }
 0x275   : > { %v1281_v24 = vpop.f32.mrf.mxu1 }
 0x276   : > { %1701 = vst [vmem:[%s2739_s29 + $0xe8] sm:$0xff] %v1661_v42  ;;  %v1662_v11 = vadd.f32 %v1610_v22, %v1502_v1  ;;  %v1503_v43 = vadd.f32 %v1463_v10, %v1278_v55  ;;  %v1282_v14 = vadd.f32 %v1281_v24, %v2713_v6 }
 0x277   : > { %v1283_v50 = vpop.f32.mrf.mxu1 }
 0x278   : > { %1702 = vst [vmem:[%s2739_s29 + $0xf0] sm:$0xff] %v1662_v11  ;;  %v1663_v2 = vadd.f32 %v1610_v22, %v1503_v43  ;;  %v1504_v9 = vadd.f32 %v2901_v46, %v1282_v14  ;;  %v1284_v23 = vadd.f32 %v1283_v50, %v2902_v12 }
 0x279   : > { %v1285_v47 = vpop.f32.mrf.mxu1 }
 0x27a   : > { %1703 = vst [vmem:[%s2739_s29 + $0xf8] sm:$0xff] %v1663_v2  ;;  %v1664_v4 = vadd.f32 %v1615_v54, %v1504_v9  ;;  %v1505_v0 = vadd.f32 %v2903_v27, %v1284_v23  ;;  %v1286_v28 = vadd.f32 %v1285_v47, %v2904_v49 }
 0x27b   : > { %v1287_v35 = vpop.f32.mrf.mxu1 }
 0x27c   : > { %1704 = vst [vmem:[%s2739_s29 + $0x100] sm:$0xff] %v1664_v4  ;;  %v1665_v6 = vadd.f32 %v1615_v54, %v1505_v0  ;;  %v1506_v56 = vadd.f32 %v2905_v18, %v1286_v28  ;;  %v1288_v38 = vadd.f32 %v1287_v35, %v2906_v21 }
 0x27d   : > { %v1291_v33 = vpop.f32.mrf.mxu1 }
 0x27e   : > { %1705 = vst [vmem:[%s2739_s29 + $0x108] sm:$0xff] %v1665_v6  ;;  %v1666_v17 = vadd.f32 %v1620_v34, %v1506_v56  ;;  %v1507_v32 = vadd.f32 %v2907_v63, %v1288_v38  ;;  %v1292_v25 = vadd.f32 %v1291_v33, %v2908_v58 }
 0x27f   : > { %v1293_v15 = vpop.f32.mrf.mxu1 }
 0x280   : > { %1706 = vst [vmem:[%s2739_s29 + $0x110] sm:$0xff] %v1666_v17  ;;  %v1667_v41 = vadd.f32 %v1620_v34, %v1507_v32  ;;  %v1508_v44 = vadd.f32 %v2909_v13, %v1292_v25  ;;  %v1294_v29 = vadd.f32 %v1293_v15, %v2910_v60 }
 0x281   : > { %v1295_v5 = vpop.f32.mrf.mxu1 }
 0x282   : > { %1707 = vst [vmem:[%s2739_s29 + $0x118] sm:$0xff] %v1667_v41  ;;  %v1668_v52 = vadd.f32 %v1625_v40, %v1508_v44  ;;  %v1509_v39 = vadd.f32 %v2911_v30, %v1294_v29  ;;  %v1296_v26 = vadd.f32 %v1295_v5, %v2912_v36 }
 0x283   : > { %v1297_v59 = vpop.f32.mrf.mxu1 }
 0x284   : > { %1708 = vst [vmem:[%s2739_s29 + $0x120] sm:$0xff] %v1668_v52  ;;  %v1669_v8 = vadd.f32 %v1625_v40, %v1509_v39  ;;  %v1510_v53 = vadd.f32 %v2913_v61, %v1296_v26  ;;  %v1298_v3 = vadd.f32 %v1297_v59, %v2914_v37 }
 0x286   : > { %1709 = vst [vmem:[%s2739_s29 + $0x128] sm:$0xff] %v1669_v8  ;;  %v1670_v51 = vadd.f32 %v1630_v48, %v1510_v53  ;;  %v1511_v16 = vadd.f32 %v2915_v57, %v1298_v3 }
 0x288   : > { %1710 = vst [vmem:[%s2739_s29 + $0x130] sm:$0xff] %v1670_v51  ;;  %v1671_v19 = vadd.f32 %v1630_v48, %v1511_v16 }
 0x28a   : > { %1711 = vst [vmem:[%s2739_s29 + $0x138] sm:$0xff] %v1671_v19 }
 0x28b PF: > { %s17_s24 = sadd.s32 1, %s2070_s24  }
 0x28c   : > { %p14_p4 = scmp.ge.s32.totalorder %s17_s24, 4  }
 0x28e   :  { %16 = sbr.rel (!%p14_p4) target bundleno = 1 (0x1), region = 78 }

</bundles_post_ra>
